<compile_context>
chip_gen: v6e
topology: v6e:2x2x1
jax: 0.10.0
libtpu: 0.0.40
codegen_flags: <defaults>
</compile_context>

<pallas_src>
import jax
import jax.numpy as jnp
import numpy as np
from jax.experimental import pallas as pl
from jax.experimental.pallas import tpu as pltpu


def _make_kernel(C1, C2, Cout, H, W, Bt, K1p, K2p, lpad):
    """Per-batch-tile fused DecBlock kernel (static shapes closed over)."""
    Cin = C1 + C2
    HW = H * W
    N = Bt * HW
    Cmax = max(Cin, Cout)

    def kernel(x1_ref, x2_ref, up_ref, mask_ref,
               w1_ref, b1_ref, w2_ref, b2_ref, o_ref, xp_ref):
        # x1_ref : (Bt, C1, H*W)        activations, spatial flattened (lane-dense)
        # x2_ref : (Bt, C2, h2*w2)
        # up_ref : (h2*w2, H*W)   bf16  one-hot nearest-neighbour gather matrix
        # mask   : (8, Bt*H*W)    f32   per-tap edge masks (tap order, no center)
        # w1_ref : (Cout, K1p)    bf16  tap-major conv1 weights, BN1 scale folded
        # w2_ref : (Cout, K2p)    bf16  tap-major conv2 weights, BN2 scale folded
        # b1/b2  : (Cout, 1)      f32   folded BatchNorm biases
        # o_ref  : (Bt, Cout, H*W)
        # xp_ref : (Cmax, lpad + Bt*H*W + lpad) f32 shared lane-padded scratch

        # ---- zero the lane halo (taps that read it are masked, but the halo
        # must hold finite values since masking is a multiply by 0.0) ---------
        z = jnp.zeros((Cmax, lpad), jnp.float32)
        xp_ref[:, 0:lpad] = z
        xp_ref[:, lpad + N:lpad + N + lpad] = z

        # ---- build the lane-concatenated conv1 input (Cin, Bt*HW) -----------
        for i in range(Bt):
            lo = lpad + i * HW
            xp_ref[0:C1, lo:lo + HW] = x1_ref[i].astype(jnp.float32)
            # nearest-neighbour upsample via one-hot gather matmul (exact)
            x2u = jnp.dot(x2_ref[i].astype(jnp.bfloat16), up_ref[...],
                          preferred_element_type=jnp.float32)
            xp_ref[C1:Cin, lo:lo + HW] = x2u

        def im2col(c, kp):
            # 9 lane-shifted views of the padded slab; row/col (and cross-image)
            # borders are zeroed with the precomputed per-tap masks.  f32 up to
            # a single bf16 cast at the MXU operand boundary (v5e-friendly).
            taps = []
            t = 0
            for dy in (-1, 0, 1):
                for dx in (-1, 0, 1):
                    s = dy * W + dx
                    v = xp_ref[0:c, lpad + s:lpad + s + N]
                    if s != 0:
                        v = v * mask_ref[t:t + 1, :]
                        t += 1
                    taps.append(v)
            if kp > 9 * c:                          # pad K to a 16-row multiple
                taps.append(jnp.zeros((kp - 9 * c, N), jnp.float32))
            return jnp.concatenate(taps, axis=0).astype(jnp.bfloat16)

        # ---- conv1 (3x3, BN1 scale folded into weights) + bias + ReLU -------
        y1 = jnp.dot(w1_ref[...], im2col(Cin, K1p),
                     preferred_element_type=jnp.float32) + b1_ref[...]
        y1 = jnp.maximum(y1, 0.0)                              # (Cout, N) f32

        # ---- conv2: reuse the same scratch for the padded y1 slab -----------
        xp_ref[0:Cout, lpad:lpad + N] = y1
        y2 = jnp.dot(w2_ref[...], im2col(Cout, K2p),
                     preferred_element_type=jnp.float32) + b2_ref[...]

        # ---- residual add + ReLU, lane-dense per-image stores ----------------
        out = jnp.maximum(y1 + y2, 0.0)
        for i in range(Bt):
            o_ref[i] = out[:, i * HW:(i + 1) * HW].astype(o_ref.dtype)

    return kernel


def dec_block_forward(x1, x2, params, *, batch_tile=None, out_dtype=None):
    """DecBlock.forward.  x1 (B,C1,H,W), x2 (B,C2,h2,w2) NCHW; returns NCHW."""
    w1_hwio, s1, b1, w2_hwio, s2, b2 = params
    B, C1, H, W = x1.shape
    _, C2, h2, w2sp = x2.shape
    Cin, Cout = C1 + C2, w1_hwio.shape[-1]
    HW = H * W
    if out_dtype is None:
        out_dtype = x1.dtype

    # Batch tile: largest divisor of B up to 4 — amortizes per-step overhead
    # and widens matmul N to Bt*HW while keeping >=2 parallel steps for B>=8.
    if batch_tile is None:
        batch_tile = max(d for d in range(1, min(B, 4) + 1) if B % d == 0)
    Bt = batch_tile
    assert B % Bt == 0, (B, Bt)
    N = Bt * HW

    # ---- trace-time constants (no HBM passes over activations) --------------
    # one-hot gather matrix for F.interpolate(mode='nearest'):
    # src = floor(dst*in/out)  (matches 'nearest', NOT 'nearest-exact')
    rows = (np.arange(H) * h2) // H
    cols = (np.arange(W) * w2sp) // W
    src = (rows[:, None] * w2sp + cols[None, :]).reshape(-1)
    up = np.zeros((h2 * w2sp, HW), np.float32)
    up[src, np.arange(HW)] = 1.0

    # per-tap edge masks (top/bottom/left/right combos) tiled over the Bt
    # lane-concatenated images; they also kill cross-image contamination.
    yy, xx = np.arange(HW) // W, np.arange(HW) % W

    def edge_mask(dy, dx):
        m = np.ones(HW, np.float32)
        if dy == -1:
            m = m * (yy != 0)
        if dy == 1:
            m = m * (yy != H - 1)
        if dx == -1:
            m = m * (xx != 0)
        if dx == 1:
            m = m * (xx != W - 1)
        return m

    mask_rows = [edge_mask(dy, dx) for dy in (-1, 0, 1) for dx in (-1, 0, 1)
                 if not (dy == 0 and dx == 0)]
    masks = np.tile(np.stack(mask_rows, axis=0), (1, Bt))          # (8, N)

    # conv weights as tap-major (Cout, 9*C) matrices with the inference-BN
    # scale folded in (trace time, f32) and K zero-padded to a 16-row multiple
    # so the bf16 im2col operand is sublane-tile aligned.
    def prep_weight(w_hwio, scale, c):
        k = 9 * c
        kp = k + (-k) % 16
        wm = jnp.transpose(w_hwio, (3, 0, 1, 2)).reshape(Cout, k)
        wm = wm * scale.reshape(Cout, 1).astype(wm.dtype)
        if kp > k:
            wm = jnp.concatenate([wm, jnp.zeros((Cout, kp - k), wm.dtype)],
                                 axis=1)
        return wm.astype(jnp.bfloat16), kp

    w1m, K1p = prep_weight(w1_hwio, s1, Cin)
    w2m, K2p = prep_weight(w2_hwio, s2, Cout)

    lpad = ((W + 1 + 127) // 128) * 128      # lane halo; keeps data stores aligned
    Cmax = max(Cin, Cout)

    kernel = _make_kernel(C1, C2, Cout, H, W, Bt, K1p, K2p, lpad)

    flops = (B * HW * 2 * Cout * (9 * Cin + 9 * Cout)
             + B * 2 * C2 * h2 * w2sp * HW)
    bytes_accessed = int(
        x1.dtype.itemsize * x1.size + x2.dtype.itemsize * x2.size
        + np.dtype(out_dtype).itemsize * B * Cout * HW
        + 2 * (up.size + Cout * (K1p + K2p)) + 4 * masks.size + 4 * 2 * Cout)

    out = pl.pallas_call(
        kernel,
        out_shape=jax.ShapeDtypeStruct((B, Cout, HW), out_dtype),
        grid_spec=pltpu.PrefetchScalarGridSpec(
            num_scalar_prefetch=0,
            grid=(B // Bt,),
            in_specs=[
                pl.BlockSpec((Bt, C1, HW), lambda b: (b, 0, 0)),           # x1
                pl.BlockSpec((Bt, C2, h2 * w2sp), lambda b: (b, 0, 0)),    # x2
                pl.BlockSpec((h2 * w2sp, HW), lambda b: (0, 0)),           # up
                pl.BlockSpec((8, N), lambda b: (0, 0)),                    # masks
                pl.BlockSpec((Cout, K1p), lambda b: (0, 0)),               # w1
                pl.BlockSpec((Cout, 1), lambda b: (0, 0)),                 # b1
                pl.BlockSpec((Cout, K2p), lambda b: (0, 0)),               # w2
                pl.BlockSpec((Cout, 1), lambda b: (0, 0)),                 # b2
            ],
            out_specs=pl.BlockSpec((Bt, Cout, HW), lambda b: (b, 0, 0)),
            scratch_shapes=[pltpu.VMEM((Cmax, N + 2 * lpad), jnp.float32)],
        ),
        compiler_params=pltpu.CompilerParams(
            dimension_semantics=("parallel",),
            vmem_limit_bytes=32 * 1024 * 1024,
        ),
        cost_estimate=pl.CostEstimate(
            flops=flops, transcendentals=0, bytes_accessed=bytes_accessed),
    )(
        x1.reshape(B, C1, HW),                         # free metadata reshape
        x2.reshape(B, C2, h2 * w2sp),                  # free metadata reshape
        jnp.asarray(up, jnp.bfloat16),
        jnp.asarray(masks, jnp.float32),
        w1m,
        b1.reshape(Cout, 1).astype(jnp.float32),
        w2m,
        b2.reshape(Cout, 1).astype(jnp.float32),
    )
    return out.reshape(B, Cout, H, W)                  # free metadata reshape


def ref_forward(x1, x2, params, operand_dtype=jnp.float32):
    """Pure-JAX reference mirroring the PyTorch module (inference BN).

    operand_dtype=jnp.bfloat16 mirrors the kernel's bf16 MXU operands and the
    trace-time scale-folding (accumulation stays f32) for a tight check.
    """
    w1_hwio, s1, b1, w2_hwio, s2, b2 = params
    B, C1, H, W = x1.shape
    _, C2, h2, w2sp = x2.shape
    rows = (jnp.arange(H) * h2) // H
    cols = (jnp.arange(W) * w2sp) // W
    x2_up = x2[:, :, rows[:, None], cols[None, :]]
    x = jnp.concatenate([x1, x2_up], axis=1)
    x_nhwc = jnp.transpose(x, (0, 2, 3, 1)).astype(jnp.float32)

    def conv_bn(v, w_hwio, s, b):
        w_eff = (w_hwio * s).astype(operand_dtype).astype(jnp.float32)
        v = v.astype(operand_dtype).astype(jnp.float32)
        o = jax.lax.conv_general_dilated(
            v, w_eff, (1, 1), 'SAME',
            dimension_numbers=('NHWC', 'HWIO', 'NHWC'),
            precision=jax.lax.Precision.HIGHEST)
        return o + b

    y1 = jax.nn.relu(conv_bn(x_nhwc, w1_hwio, s1, b1))
    y2 = conv_bn(y1, w2_hwio, s2, b2)
    out = jax.nn.relu(y1 + y2)
    return jnp.transpose(out, (0, 3, 1, 2))


if __name__ == "__main__":
    B, C1, C2, Cout = 2, 4, 4, 8
    H = W = 16
    h2 = w2sp = 8
    Cin = C1 + C2
    eps = 1e-5

    key = jax.random.PRNGKey(0)
    ks = jax.random.split(key, 12)

    x1 = jax.random.normal(ks[0], (B, C1, H, W), jnp.float32)
    x2 = jax.random.normal(ks[1], (B, C2, h2, w2sp), jnp.float32)

    # conv1 (in=Cin, out=Cout, 3x3, bias=False) + BN1 (inference-folded)
    w1_hwio = 0.1 * jax.random.normal(ks[2], (3, 3, Cin, Cout), jnp.float32)
    g1 = jax.random.uniform(ks[3], (Cout,), jnp.float32, 0.5, 1.5)
    be1 = 0.1 * jax.random.normal(ks[4], (Cout,), jnp.float32)
    m1 = 0.1 * jax.random.normal(ks[5], (Cout,), jnp.float32)
    v1 = jax.random.uniform(ks[6], (Cout,), jnp.float32, 0.5, 1.5)
    s1 = g1 / jnp.sqrt(v1 + eps)
    b1 = be1 - m1 * s1

    # conv2 (in=Cout, out=Cout, 3x3, bias=False) + BN2
    w2_hwio = 0.1 * jax.random.normal(ks[7], (3, 3, Cout, Cout), jnp.float32)
    g2 = jax.random.uniform(ks[8], (Cout,), jnp.float32, 0.5, 1.5)
    be2 = 0.1 * jax.random.normal(ks[9], (Cout,), jnp.float32)
    m2 = 0.1 * jax.random.normal(ks[10], (Cout,), jnp.float32)
    v2 = jax.random.uniform(ks[11], (Cout,), jnp.float32, 0.5, 1.5)
    s2 = g2 / jnp.sqrt(v2 + eps)
    b2 = be2 - m2 * s2

    params = (w1_hwio, s1, b1, w2_hwio, s2, b2)

    out = jax.jit(dec_block_forward)(x1, x2, params)
    out = jax.block_until_ready(out)
    assert out.shape == (B, Cout, H, W), out.shape

    # tight check against a reference with matching bf16 operands + folded BN
    ref_bf16 = ref_forward(x1, x2, params, operand_dtype=jnp.bfloat16)
    err_tight = float(jnp.max(jnp.abs(out - ref_bf16)))
    assert jnp.allclose(out, ref_bf16, atol=2e-2, rtol=2e-2), err_tight

    # sanity check against the full-f32 reference (bf16-operand tolerance)
    ref_f32 = ref_forward(x1, x2, params, operand_dtype=jnp.float32)
    err_loose = float(jnp.max(jnp.abs(out - ref_f32)))
    assert jnp.allclose(out, ref_f32, atol=1e-1, rtol=1e-1), err_loose

    print("KERNEL_OK")
</pallas_src>

<mosaic_0001>
module attributes {stable_mosaic.version = 11 : i64} {
  func.func @kernel(%arg0: i32, %arg1: memref<2x4x256xf32, #tpu.memory_space<vmem>>, %arg2: memref<2x4x64xf32, #tpu.memory_space<vmem>>, %arg3: memref<64x256xbf16, #tpu.memory_space<vmem>>, %arg4: memref<8x512xf32, #tpu.memory_space<vmem>>, %arg5: memref<8x80xbf16, #tpu.memory_space<vmem>>, %arg6: memref<8x1xf32, #tpu.memory_space<vmem>>, %arg7: memref<8x80xbf16, #tpu.memory_space<vmem>>, %arg8: memref<8x1xf32, #tpu.memory_space<vmem>>, %arg9: memref<2x8x256xf32, #tpu.memory_space<vmem>>, %arg10: memref<8x768xf32, #tpu.memory_space<vmem>>) attributes {dimension_semantics = [#tpu.dimension_semantics<parallel>], iteration_bounds = array<i64: 1>, scalar_prefetch = 0 : i64, scratch_operands = 1 : i64, tpu.core_type = #tpu.core_type<tc>, window_params = [{transform_indices = @transform_0, window_bounds = array<i64: 2, 4, 256>}, {transform_indices = @transform_1, window_bounds = array<i64: 2, 4, 64>}, {pipeline_mode = #tpu.pipeline_mode<synchronous>, transform_indices = @transform_2, window_bounds = array<i64: 64, 256>}, {pipeline_mode = #tpu.pipeline_mode<synchronous>, transform_indices = @transform_3, window_bounds = array<i64: 8, 512>}, {pipeline_mode = #tpu.pipeline_mode<synchronous>, transform_indices = @transform_4, window_bounds = array<i64: 8, 80>}, {pipeline_mode = #tpu.pipeline_mode<synchronous>, transform_indices = @transform_5, window_bounds = array<i64: 8, 1>}, {pipeline_mode = #tpu.pipeline_mode<synchronous>, transform_indices = @transform_6, window_bounds = array<i64: 8, 80>}, {pipeline_mode = #tpu.pipeline_mode<synchronous>, transform_indices = @transform_7, window_bounds = array<i64: 8, 1>}, {transform_indices = @transform_8, window_bounds = array<i64: 2, 8, 256>}]} {
    %cst = arith.constant 0.000000e+00 : f32
    %0 = vector.broadcast %cst : f32 to vector<8x128xf32>
    %c0 = arith.constant 0 : index
    %c0_0 = arith.constant 0 : index
    %1 = vector.load %arg10[%c0, %c0_0] : memref<8x768xf32, #tpu.memory_space<vmem>>, vector<8x128xf32>
    tpu.vector_store %arg10[%c0, %c0_0], %0 {strides = array<i32>} : memref<8x768xf32, #tpu.memory_space<vmem>>, vector<8x128xf32>,
    %c0_1 = arith.constant 0 : index
    %c640 = arith.constant 640 : index
    %2 = vector.load %arg10[%c0_1, %c640] : memref<8x768xf32, #tpu.memory_space<vmem>>, vector<8x128xf32>
    tpu.vector_store %arg10[%c0_1, %c640], %0 {strides = array<i32>} : memref<8x768xf32, #tpu.memory_space<vmem>>, vector<8x128xf32>,
    %c0_2 = arith.constant 0 : index
    %c0_3 = arith.constant 0 : index
    %c0_4 = arith.constant 0 : index
    %3 = vector.load %arg1[%c0_2, %c0_3, %c0_4] : memref<2x4x256xf32, #tpu.memory_space<vmem>>, vector<1x4x256xf32>
    %4 = vector.shape_cast %3 : vector<1x4x256xf32> to vector<4x256xf32>
    %c0_5 = arith.constant 0 : index
    %c128 = arith.constant 128 : index
    %5 = vector.load %arg10[%c0_5, %c128] : memref<8x768xf32, #tpu.memory_space<vmem>>, vector<4x256xf32>
    tpu.vector_store %arg10[%c0_5, %c128], %4 {strides = array<i32>} : memref<8x768xf32, #tpu.memory_space<vmem>>, vector<4x256xf32>,
    %c0_6 = arith.constant 0 : index
    %c0_7 = arith.constant 0 : index
    %c0_8 = arith.constant 0 : index
    %6 = vector.load %arg2[%c0_6, %c0_7, %c0_8] : memref<2x4x64xf32, #tpu.memory_space<vmem>>, vector<1x4x64xf32>
    %7 = vector.shape_cast %6 : vector<1x4x64xf32> to vector<4x64xf32>
    %8 = arith.truncf %7 : vector<4x64xf32> to vector<4x64xbf16>
    %c0_9 = arith.constant 0 : index
    %c0_10 = arith.constant 0 : index
    %9 = vector.load %arg3[%c0_9, %c0_10] : memref<64x256xbf16, #tpu.memory_space<vmem>>, vector<64x256xbf16>
    %cst_11 = arith.constant dense<0.000000e+00> : vector<4x256xf32>
    %10 = tpu.matmul %8, %9, %cst_11 {dimension_numbers = #tpu.dot_dimension_numbers<[1], [0], [0], [1], [0, 0, 1, 1], [], []>} : vector<4x64xbf16>, vector<64x256xbf16>, vector<4x256xf32> -> vector<4x256xf32>
    %c4 = arith.constant 4 : index
    %c128_12 = arith.constant 128 : index
    %11 = vector.load %arg10[%c4, %c128_12] : memref<8x768xf32, #tpu.memory_space<vmem>>, vector<4x256xf32>
    tpu.vector_store %arg10[%c4, %c128_12], %10 {strides = array<i32>} : memref<8x768xf32, #tpu.memory_space<vmem>>, vector<4x256xf32>,
    %c1 = arith.constant 1 : index
    %c0_13 = arith.constant 0 : index
    %c0_14 = arith.constant 0 : index
    %12 = vector.load %arg1[%c1, %c0_13, %c0_14] : memref<2x4x256xf32, #tpu.memory_space<vmem>>, vector<1x4x256xf32>
    %13 = vector.shape_cast %12 : vector<1x4x256xf32> to vector<4x256xf32>
    %c0_15 = arith.constant 0 : index
    %c384 = arith.constant 384 : index
    %14 = vector.load %arg10[%c0_15, %c384] : memref<8x768xf32, #tpu.memory_space<vmem>>, vector<4x256xf32>
    tpu.vector_store %arg10[%c0_15, %c384], %13 {strides = array<i32>} : memref<8x768xf32, #tpu.memory_space<vmem>>, vector<4x256xf32>,
    %c1_16 = arith.constant 1 : index
    %c0_17 = arith.constant 0 : index
    %c0_18 = arith.constant 0 : index
    %15 = vector.load %arg2[%c1_16, %c0_17, %c0_18] : memref<2x4x64xf32, #tpu.memory_space<vmem>>, vector<1x4x64xf32>
    %16 = vector.shape_cast %15 : vector<1x4x64xf32> to vector<4x64xf32>
    %17 = arith.truncf %16 : vector<4x64xf32> to vector<4x64xbf16>
    %c0_19 = arith.constant 0 : index
    %c0_20 = arith.constant 0 : index
    %18 = vector.load %arg3[%c0_19, %c0_20] : memref<64x256xbf16, #tpu.memory_space<vmem>>, vector<64x256xbf16>
    %cst_21 = arith.constant dense<0.000000e+00> : vector<4x256xf32>
    %19 = tpu.matmul %17, %18, %cst_21 {dimension_numbers = #tpu.dot_dimension_numbers<[1], [0], [0], [1], [0, 0, 1, 1], [], []>} : vector<4x64xbf16>, vector<64x256xbf16>, vector<4x256xf32> -> vector<4x256xf32>
    %c4_22 = arith.constant 4 : index
    %c384_23 = arith.constant 384 : index
    %20 = vector.load %arg10[%c4_22, %c384_23] : memref<8x768xf32, #tpu.memory_space<vmem>>, vector<4x256xf32>
    tpu.vector_store %arg10[%c4_22, %c384_23], %19 {strides = array<i32>} : memref<8x768xf32, #tpu.memory_space<vmem>>, vector<4x256xf32>,
    %c0_24 = arith.constant 0 : index
    %c0_25 = arith.constant 0 : index
    %21 = vector.load %arg5[%c0_24, %c0_25] : memref<8x80xbf16, #tpu.memory_space<vmem>>, vector<8x80xbf16>
    %c0_26 = arith.constant 0 : index
    %c111 = arith.constant 111 : index
    %22 = vector.load %arg10[%c0_26, %c111] : memref<8x768xf32, #tpu.memory_space<vmem>>, vector<8x512xf32>
    %c0_27 = arith.constant 0 : index
    %c0_28 = arith.constant 0 : index
    %23 = vector.load %arg4[%c0_27, %c0_28] : memref<8x512xf32, #tpu.memory_space<vmem>>, vector<1x512xf32>
    %24 = vector.broadcast %23 : vector<1x512xf32> to vector<8x512xf32>
    %25 = arith.mulf %22, %24 : vector<8x512xf32>
    %c0_29 = arith.constant 0 : index
    %c112 = arith.constant 112 : index
    %26 = vector.load %arg10[%c0_29, %c112] : memref<8x768xf32, #tpu.memory_space<vmem>>, vector<8x512xf32>
    %c1_30 = arith.constant 1 : index
    %c0_31 = arith.constant 0 : index
    %27 = vector.load %arg4[%c1_30, %c0_31] : memref<8x512xf32, #tpu.memory_space<vmem>>, vector<1x512xf32>
    %28 = vector.broadcast %27 : vector<1x512xf32> to vector<8x512xf32>
    %29 = arith.mulf %26, %28 : vector<8x512xf32>
    %c0_32 = arith.constant 0 : index
    %c113 = arith.constant 113 : index
    %30 = vector.load %arg10[%c0_32, %c113] : memref<8x768xf32, #tpu.memory_space<vmem>>, vector<8x512xf32>
    %c2 = arith.constant 2 : index
    %c0_33 = arith.constant 0 : index
    %31 = vector.load %arg4[%c2, %c0_33] : memref<8x512xf32, #tpu.memory_space<vmem>>, vector<1x512xf32>
    %32 = vector.broadcast %31 : vector<1x512xf32> to vector<8x512xf32>
    %33 = arith.mulf %30, %32 : vector<8x512xf32>
    %c0_34 = arith.constant 0 : index
    %c127 = arith.constant 127 : index
    %34 = vector.load %arg10[%c0_34, %c127] : memref<8x768xf32, #tpu.memory_space<vmem>>, vector<8x512xf32>
    %c3 = arith.constant 3 : index
    %c0_35 = arith.constant 0 : index
    %35 = vector.load %arg4[%c3, %c0_35] : memref<8x512xf32, #tpu.memory_space<vmem>>, vector<1x512xf32>
    %36 = vector.broadcast %35 : vector<1x512xf32> to vector<8x512xf32>
    %37 = arith.mulf %34, %36 : vector<8x512xf32>
    %c0_36 = arith.constant 0 : index
    %c128_37 = arith.constant 128 : index
    %38 = vector.load %arg10[%c0_36, %c128_37] : memref<8x768xf32, #tpu.memory_space<vmem>>, vector<8x512xf32>
    %c0_38 = arith.constant 0 : index
    %c129 = arith.constant 129 : index
    %39 = vector.load %arg10[%c0_38, %c129] : memref<8x768xf32, #tpu.memory_space<vmem>>, vector<8x512xf32>
    %c4_39 = arith.constant 4 : index
    %c0_40 = arith.constant 0 : index
    %40 = vector.load %arg4[%c4_39, %c0_40] : memref<8x512xf32, #tpu.memory_space<vmem>>, vector<1x512xf32>
    %41 = vector.broadcast %40 : vector<1x512xf32> to vector<8x512xf32>
    %42 = arith.mulf %39, %41 : vector<8x512xf32>
    %c0_41 = arith.constant 0 : index
    %c143 = arith.constant 143 : index
    %43 = vector.load %arg10[%c0_41, %c143] : memref<8x768xf32, #tpu.memory_space<vmem>>, vector<8x512xf32>
    %c5 = arith.constant 5 : index
    %c0_42 = arith.constant 0 : index
    %44 = vector.load %arg4[%c5, %c0_42] : memref<8x512xf32, #tpu.memory_space<vmem>>, vector<1x512xf32>
    %45 = vector.broadcast %44 : vector<1x512xf32> to vector<8x512xf32>
    %46 = arith.mulf %43, %45 : vector<8x512xf32>
    %c0_43 = arith.constant 0 : index
    %c144 = arith.constant 144 : index
    %47 = vector.load %arg10[%c0_43, %c144] : memref<8x768xf32, #tpu.memory_space<vmem>>, vector<8x512xf32>
    %c6 = arith.constant 6 : index
    %c0_44 = arith.constant 0 : index
    %48 = vector.load %arg4[%c6, %c0_44] : memref<8x512xf32, #tpu.memory_space<vmem>>, vector<1x512xf32>
    %49 = vector.broadcast %48 : vector<1x512xf32> to vector<8x512xf32>
    %50 = arith.mulf %47, %49 : vector<8x512xf32>
    %c0_45 = arith.constant 0 : index
    %c145 = arith.constant 145 : index
    %51 = vector.load %arg10[%c0_45, %c145] : memref<8x768xf32, #tpu.memory_space<vmem>>, vector<8x512xf32>
    %c7 = arith.constant 7 : index
    %c0_46 = arith.constant 0 : index
    %52 = vector.load %arg4[%c7, %c0_46] : memref<8x512xf32, #tpu.memory_space<vmem>>, vector<1x512xf32>
    %53 = vector.broadcast %52 : vector<1x512xf32> to vector<8x512xf32>
    %54 = arith.mulf %51, %53 : vector<8x512xf32>
    %cst_47 = arith.constant 0.000000e+00 : f32
    %55 = vector.broadcast %cst_47 : f32 to vector<8x512xf32>
    %56 = tpu.concatenate %25, %29, %33, %37, %38, %42, %46, %50, %54, %55 in 0 : vector<8x512xf32>, vector<8x512xf32>, vector<8x512xf32>, vector<8x512xf32>, vector<8x512xf32>, vector<8x512xf32>, vector<8x512xf32>, vector<8x512xf32>, vector<8x512xf32>, vector<8x512xf32> -> vector<80x512xf32>
    %57 = arith.truncf %56 : vector<80x512xf32> to vector<80x512xbf16>
    %cst_48 = arith.constant dense<0.000000e+00> : vector<8x512xf32>
    %58 = tpu.matmul %21, %57, %cst_48 {dimension_numbers = #tpu.dot_dimension_numbers<[1], [0], [0], [1], [0, 0, 1, 1], [], []>} : vector<8x80xbf16>, vector<80x512xbf16>, vector<8x512xf32> -> vector<8x512xf32>
    %c0_49 = arith.constant 0 : index
    %c0_50 = arith.constant 0 : index
    %59 = vector.load %arg6[%c0_49, %c0_50] : memref<8x1xf32, #tpu.memory_space<vmem>>, vector<8x1xf32>
    %60 = vector.broadcast %59 : vector<8x1xf32> to vector<8x512xf32>
    %61 = arith.addf %58, %60 : vector<8x512xf32>
    %cst_51 = arith.constant 0.000000e+00 : f32
    %62 = vector.broadcast %cst_51 : f32 to vector<8x512xf32>
    %63 = arith.maximumf %61, %62 : vector<8x512xf32>
    %c0_52 = arith.constant 0 : index
    %c128_53 = arith.constant 128 : index
    %64 = vector.load %arg10[%c0_52, %c128_53] : memref<8x768xf32, #tpu.memory_space<vmem>>, vector<8x512xf32>
    tpu.vector_store %arg10[%c0_52, %c128_53], %63 {strides = array<i32>} : memref<8x768xf32, #tpu.memory_space<vmem>>, vector<8x512xf32>,
    %c0_54 = arith.constant 0 : index
    %c0_55 = arith.constant 0 : index
    %65 = vector.load %arg7[%c0_54, %c0_55] : memref<8x80xbf16, #tpu.memory_space<vmem>>, vector<8x80xbf16>
    %c0_56 = arith.constant 0 : index
    %c111_57 = arith.constant 111 : index
    %66 = vector.load %arg10[%c0_56, %c111_57] : memref<8x768xf32, #tpu.memory_space<vmem>>, vector<8x512xf32>
    %c0_58 = arith.constant 0 : index
    %c0_59 = arith.constant 0 : index
    %67 = vector.load %arg4[%c0_58, %c0_59] : memref<8x512xf32, #tpu.memory_space<vmem>>, vector<1x512xf32>
    %68 = vector.broadcast %67 : vector<1x512xf32> to vector<8x512xf32>
    %69 = arith.mulf %66, %68 : vector<8x512xf32>
    %c0_60 = arith.constant 0 : index
    %c112_61 = arith.constant 112 : index
    %70 = vector.load %arg10[%c0_60, %c112_61] : memref<8x768xf32, #tpu.memory_space<vmem>>, vector<8x512xf32>
    %c1_62 = arith.constant 1 : index
    %c0_63 = arith.constant 0 : index
    %71 = vector.load %arg4[%c1_62, %c0_63] : memref<8x512xf32, #tpu.memory_space<vmem>>, vector<1x512xf32>
    %72 = vector.broadcast %71 : vector<1x512xf32> to vector<8x512xf32>
    %73 = arith.mulf %70, %72 : vector<8x512xf32>
    %c0_64 = arith.constant 0 : index
    %c113_65 = arith.constant 113 : index
    %74 = vector.load %arg10[%c0_64, %c113_65] : memref<8x768xf32, #tpu.memory_space<vmem>>, vector<8x512xf32>
    %c2_66 = arith.constant 2 : index
    %c0_67 = arith.constant 0 : index
    %75 = vector.load %arg4[%c2_66, %c0_67] : memref<8x512xf32, #tpu.memory_space<vmem>>, vector<1x512xf32>
    %76 = vector.broadcast %75 : vector<1x512xf32> to vector<8x512xf32>
    %77 = arith.mulf %74, %76 : vector<8x512xf32>
    %c0_68 = arith.constant 0 : index
    %c127_69 = arith.constant 127 : index
    %78 = vector.load %arg10[%c0_68, %c127_69] : memref<8x768xf32, #tpu.memory_space<vmem>>, vector<8x512xf32>
    %c3_70 = arith.constant 3 : index
    %c0_71 = arith.constant 0 : index
    %79 = vector.load %arg4[%c3_70, %c0_71] : memref<8x512xf32, #tpu.memory_space<vmem>>, vector<1x512xf32>
    %80 = vector.broadcast %79 : vector<1x512xf32> to vector<8x512xf32>
    %81 = arith.mulf %78, %80 : vector<8x512xf32>
    %c0_72 = arith.constant 0 : index
    %c128_73 = arith.constant 128 : index
    %82 = vector.load %arg10[%c0_72, %c128_73] : memref<8x768xf32, #tpu.memory_space<vmem>>, vector<8x512xf32>
    %c0_74 = arith.constant 0 : index
    %c129_75 = arith.constant 129 : index
    %83 = vector.load %arg10[%c0_74, %c129_75] : memref<8x768xf32, #tpu.memory_space<vmem>>, vector<8x512xf32>
    %c4_76 = arith.constant 4 : index
    %c0_77 = arith.constant 0 : index
    %84 = vector.load %arg4[%c4_76, %c0_77] : memref<8x512xf32, #tpu.memory_space<vmem>>, vector<1x512xf32>
    %85 = vector.broadcast %84 : vector<1x512xf32> to vector<8x512xf32>
    %86 = arith.mulf %83, %85 : vector<8x512xf32>
    %c0_78 = arith.constant 0 : index
    %c143_79 = arith.constant 143 : index
    %87 = vector.load %arg10[%c0_78, %c143_79] : memref<8x768xf32, #tpu.memory_space<vmem>>, vector<8x512xf32>
    %c5_80 = arith.constant 5 : index
    %c0_81 = arith.constant 0 : index
    %88 = vector.load %arg4[%c5_80, %c0_81] : memref<8x512xf32, #tpu.memory_space<vmem>>, vector<1x512xf32>
    %89 = vector.broadcast %88 : vector<1x512xf32> to vector<8x512xf32>
    %90 = arith.mulf %87, %89 : vector<8x512xf32>
    %c0_82 = arith.constant 0 : index
    %c144_83 = arith.constant 144 : index
    %91 = vector.load %arg10[%c0_82, %c144_83] : memref<8x768xf32, #tpu.memory_space<vmem>>, vector<8x512xf32>
    %c6_84 = arith.constant 6 : index
    %c0_85 = arith.constant 0 : index
    %92 = vector.load %arg4[%c6_84, %c0_85] : memref<8x512xf32, #tpu.memory_space<vmem>>, vector<1x512xf32>
    %93 = vector.broadcast %92 : vector<1x512xf32> to vector<8x512xf32>
    %94 = arith.mulf %91, %93 : vector<8x512xf32>
    %c0_86 = arith.constant 0 : index
    %c145_87 = arith.constant 145 : index
    %95 = vector.load %arg10[%c0_86, %c145_87] : memref<8x768xf32, #tpu.memory_space<vmem>>, vector<8x512xf32>
    %c7_88 = arith.constant 7 : index
    %c0_89 = arith.constant 0 : index
    %96 = vector.load %arg4[%c7_88, %c0_89] : memref<8x512xf32, #tpu.memory_space<vmem>>, vector<1x512xf32>
    %97 = vector.broadcast %96 : vector<1x512xf32> to vector<8x512xf32>
    %98 = arith.mulf %95, %97 : vector<8x512xf32>
    %cst_90 = arith.constant 0.000000e+00 : f32
    %99 = vector.broadcast %cst_90 : f32 to vector<8x512xf32>
    %100 = tpu.concatenate %69, %73, %77, %81, %82, %86, %90, %94, %98, %99 in 0 : vector<8x512xf32>, vector<8x512xf32>, vector<8x512xf32>, vector<8x512xf32>, vector<8x512xf32>, vector<8x512xf32>, vector<8x512xf32>, vector<8x512xf32>, vector<8x512xf32>, vector<8x512xf32> -> vector<80x512xf32>
    %101 = arith.truncf %100 : vector<80x512xf32> to vector<80x512xbf16>
    %cst_91 = arith.constant dense<0.000000e+00> : vector<8x512xf32>
    %102 = tpu.matmul %65, %101, %cst_91 {dimension_numbers = #tpu.dot_dimension_numbers<[1], [0], [0], [1], [0, 0, 1, 1], [], []>} : vector<8x80xbf16>, vector<80x512xbf16>, vector<8x512xf32> -> vector<8x512xf32>
    %c0_92 = arith.constant 0 : index
    %c0_93 = arith.constant 0 : index
    %103 = vector.load %arg8[%c0_92, %c0_93] : memref<8x1xf32, #tpu.memory_space<vmem>>, vector<8x1xf32>
    %104 = vector.broadcast %103 : vector<8x1xf32> to vector<8x512xf32>
    %105 = arith.addf %102, %104 : vector<8x512xf32>
    %106 = arith.addf %63, %105 : vector<8x512xf32>
    %cst_94 = arith.constant 0.000000e+00 : f32
    %107 = vector.broadcast %cst_94 : f32 to vector<8x512xf32>
    %108 = arith.maximumf %106, %107 : vector<8x512xf32>
    %109 = vector.extract_strided_slice %108 {offsets = [0, 0], sizes = [8, 256], strides = [1, 1]} : vector<8x512xf32> to vector<8x256xf32>
    %c0_95 = arith.constant 0 : index
    %c0_96 = arith.constant 0 : index
    %c0_97 = arith.constant 0 : index
    %110 = vector.load %arg9[%c0_95, %c0_96, %c0_97] : memref<2x8x256xf32, #tpu.memory_space<vmem>>, vector<1x8x256xf32>
    %111 = vector.shape_cast %110 : vector<1x8x256xf32> to vector<8x256xf32>
    %112 = vector.shape_cast %109 : vector<8x256xf32> to vector<1x8x256xf32>
    tpu.vector_store %arg9[%c0_95, %c0_96, %c0_97], %112 {strides = array<i32>} : memref<2x8x256xf32, #tpu.memory_space<vmem>>, vector<1x8x256xf32>,
    %113 = vector.extract_strided_slice %108 {offsets = [0, 256], sizes = [8, 256], strides = [1, 1]} : vector<8x512xf32> to vector<8x256xf32>
    %c1_98 = arith.constant 1 : index
    %c0_99 = arith.constant 0 : index
    %c0_100 = arith.constant 0 : index
    %114 = vector.load %arg9[%c1_98, %c0_99, %c0_100] : memref<2x8x256xf32, #tpu.memory_space<vmem>>, vector<1x8x256xf32>
    %115 = vector.shape_cast %114 : vector<1x8x256xf32> to vector<8x256xf32>
    %116 = vector.shape_cast %113 : vector<8x256xf32> to vector<1x8x256xf32>
    tpu.vector_store %arg9[%c1_98, %c0_99, %c0_100], %116 {strides = array<i32>} : memref<2x8x256xf32, #tpu.memory_space<vmem>>, vector<1x8x256xf32>,
    return
  }
  func.func @transform_0(%arg0: i32) -> (i32, i32, i32) {
    %c0_i32 = arith.constant 0 : i32
    %c0_i32_0 = arith.constant 0 : i32
    %c0_i32_1 = arith.constant 0 : i32
    return %arg0, %c0_i32, %c0_i32_0 : i32, i32, i32
  }
  func.func @transform_1(%arg0: i32) -> (i32, i32, i32) {
    %c0_i32 = arith.constant 0 : i32
    %c0_i32_0 = arith.constant 0 : i32
    %c0_i32_1 = arith.constant 0 : i32
    return %arg0, %c0_i32, %c0_i32_0 : i32, i32, i32
  }
  func.func @transform_2(%arg0: i32) -> (i32, i32) {
    %c0_i32 = arith.constant 0 : i32
    %c0_i32_0 = arith.constant 0 : i32
    %c0_i32_1 = arith.constant 0 : i32
    return %c0_i32, %c0_i32_0 : i32, i32
  }
  func.func @transform_3(%arg0: i32) -> (i32, i32) {
    %c0_i32 = arith.constant 0 : i32
    %c0_i32_0 = arith.constant 0 : i32
    %c0_i32_1 = arith.constant 0 : i32
    return %c0_i32, %c0_i32_0 : i32, i32
  }
  func.func @transform_4(%arg0: i32) -> (i32, i32) {
    %c0_i32 = arith.constant 0 : i32
    %c0_i32_0 = arith.constant 0 : i32
    %c0_i32_1 = arith.constant 0 : i32
    return %c0_i32, %c0_i32_0 : i32, i32
  }
  func.func @transform_5(%arg0: i32) -> (i32, i32) {
    %c0_i32 = arith.constant 0 : i32
    %c0_i32_0 = arith.constant 0 : i32
    %c0_i32_1 = arith.constant 0 : i32
    return %c0_i32, %c0_i32_0 : i32, i32
  }
  func.func @transform_6(%arg0: i32) -> (i32, i32) {
    %c0_i32 = arith.constant 0 : i32
    %c0_i32_0 = arith.constant 0 : i32
    %c0_i32_1 = arith.constant 0 : i32
    return %c0_i32, %c0_i32_0 : i32, i32
  }
  func.func @transform_7(%arg0: i32) -> (i32, i32) {
    %c0_i32 = arith.constant 0 : i32
    %c0_i32_0 = arith.constant 0 : i32
    %c0_i32_1 = arith.constant 0 : i32
    return %c0_i32, %c0_i32_0 : i32, i32
  }
  func.func @transform_8(%arg0: i32) -> (i32, i32, i32) {
    %c0_i32 = arith.constant 0 : i32
    %c0_i32_0 = arith.constant 0 : i32
    %c0_i32_1 = arith.constant 0 : i32
    return %arg0, %c0_i32, %c0_i32_0 : i32, i32, i32
  }
}

</mosaic_0001>

<bundles_post_ra>
// kernel: dec_block_forward.1
= control target key start
LH: loop header
LB: loop body
LE: loop exit
PB: predicated region body
PF: predicated region fallthrough
CT: control target
= control target key end

     0   :  { %v259_v0 = vlaneseq  ;;  %v2013_v2 = vmov 0   ;;  %v2014_v3 = vmov 0.0   ;;  %s2015_s21 = smov 17   ;;  %vm88_vm0 = vcmask 523264   ;;  %s2017_s9 = smov 16   ;;  %s3047_s2 = inlined_call_operand.vmem [shape: bf16[64,256], index: 2, kind: input, shape index: {}]   ;;  %s3048_s3 = inlined_call_operand.vmem [shape: f32[8,512], index: 3, kind: input, shape index: {}]   ;;  %s3049_s1 = inlined_call_operand.vmem [shape: f32[2,4,64], index: 1, kind: input, shape index: {}]   ;;  %s3050_s0 = inlined_call_operand.vmem [shape: f32[2,4,256], index: 0, kind: input, shape index: {}]   ;;  %s3051_s5 = inlined_call_operand.vmem [shape: f32[8,1], index: 5, kind: input, shape index: {}]   ;;  %s3052_s4 = inlined_call_operand.vmem [shape: bf16[8,80], index: 4, kind: input, shape index: {}]   ;;  %s3053_s7 = inlined_call_operand.vmem [shape: f32[8,1], index: 7, kind: input, shape index: {}]   ;;  %s3054_s6 = inlined_call_operand.vmem [shape: bf16[8,80], index: 6, kind: input, shape index: {}]   ;;  %s3055_s8 = inlined_call_operand.vmem [shape: f32[2,8,256], index: 8, kind: output, shape index: {}]  }
   0x1   :  { %v1998_v1 = vld [vmem:[%s3047_s2 + $0x34] ss:$8 sps:$4 sm:$0xff]   ;;  %124 = vmatprep.mubr.bf16.mxu0 %v2013_v2  ;;  %234 = vmatprep.mubr.bf16.mxu1 %v2013_v2  ;;  %31 = vst [vmem:[#allocation2 + $0x8] sm:$0xff] %v2014_v3  ;;  %v2000_v4 = vld [vmem:[%s3047_s2 + $0x30] ss:$8 sps:$4 sm:$0xff]   ;;  %s2018_s12 = smov 1  }
   0x2   :  { %v260_v5 = vshrl.u32 %v259_v0, 7  ;;  %1917 = vset.pattern.permute.xlu0 %v2013_v2  ;;  %100 = vmatprep.subr.bf16.mxu0 %v1998_v1  ;;  %v2001_v6 = vld [vmem:[%s3047_s2 + $0x24] ss:$8 sps:$4 sm:$0xff]   ;;  %v2003_v7 = vld [vmem:[%s3047_s2 + $0x20] ss:$8 sps:$4 sm:$0xff]   ;;  %s2019_s15 = smov 113  }
   0x3   :  { %210 = vmatprep.subr.bf16.mxu1 %v1998_v1  ;;  %101 = vmatpush1.bf16.msra.mxu0 %v2000_v4  ;;  %v2004_v9 = vld [vmem:[%s3047_s2 + $0x14] ss:$8 sps:$4 sm:$0xff]   ;;  %v2006_v14 = vld [vmem:[%s3047_s2 + $0x10] ss:$8 sps:$4 sm:$0xff]   ;;  %v2007_v17 = vld [vmem:[%s3047_s2 + $0x4] ss:$8 sps:$4 sm:$0xff]  }
   0x4   :  { %211 = vmatpush1.bf16.msra.mxu1 %v2000_v4  ;;  %v2089_v8 = vsub.s32 2, %v260_v5  ;;  %102 = vmatprep.subr.bf16.mxu0 %v2001_v6  ;;  %v2094_v10 = vsub.s32 0, %v260_v5  ;;  %v2096_v11 = vsub.s32 3, %v260_v5  ;;  %v1808_v12 = vld [vmem:[%s3048_s3 + $0x7] ss:$8 sm:$0xf] }
   0x5   :  { %212 = vmatprep.subr.bf16.mxu1 %v2001_v6  ;;  %v2101_v13 = vsub.s32 1, %v260_v5  ;;  %v1806_v20 = vld [vmem:[%s3048_s3 + $0x5] ss:$8 sm:$0xf]  ;;  %v2009_v21 = vld [vmem:[%s3047_s2] ss:$8 sps:$4 sm:$0xff]  }
   0x6   :  { %v562_v15 = vrot.slane %v1808_v12, %v2089_v8  ;;  %v554_v16 = vrot.slane %v1808_v12, %v2094_v10  ;;  %v566_v18 = vrot.slane %v1808_v12, %v2096_v11  ;;  %v38_v22 = vld [vmem:[%s3049_s1] sm:$0xf]  ;;  %v1792_v23 = vld [vmem:[%s3049_s1 + $0x4] sm:$0xf]  ;;  %v472_v25 = vrot.slane %v1806_v20, %v2094_v10  ;;  %s2016_s2 = smov 15   ;;  %s2020_s18 = smov 127  }
   0x7   :  { %103 = vmatpush1.bf16.msra.mxu0 %v2003_v7  ;;  %v558_v19 = vrot.slane %v1808_v12, %v2101_v13  ;;  %v476_v24 = vrot.slane %v1806_v20, %v2101_v13  ;;  %v39_v26 = vpack.c.bf16 %v38_v22, %v38_v22  ;;  %v150_v27 = vpack.c.bf16 %v1792_v23, %v1792_v23  ;;  %v1807_v30 = vld [vmem:[%s3048_s3 + $0x6] ss:$8 sm:$0xf]  ;;  %v1805_v35 = vld [vmem:[%s3048_s3 + $0x4] ss:$8 sm:$0xf] }
   0x8   :  { %213 = vmatpush1.bf16.msra.mxu1 %v2003_v7  ;;  %104 = vmatprep.subr.bf16.mxu0 %v2004_v9  ;;  %v484_v28 = vrot.slane %v1806_v20, %v2096_v11  ;;  %v480_v29 = vrot.slane %v1806_v20, %v2089_v8  ;;  %v517_v31 = vrot.slane %v1807_v30, %v2101_v13  ;;  %v1803_v40 = vld [vmem:[%s3048_s3 + $0x2] ss:$8 sm:$0xf]  ;;  %v1804_v45 = vld [vmem:[%s3048_s3 + $0x3] ss:$8 sm:$0xf] }
   0x9   :  { %214 = vmatprep.subr.bf16.mxu1 %v2004_v9  ;;  %571 = vrot.lane.b32.xlu1 %v562_v15, %s2015_s21  ;;  %v513_v32 = vrot.slane %v1807_v30, %v2094_v10  ;;  %v525_v33 = vrot.slane %v1807_v30, %v2096_v11  ;;  %v521_v34 = vrot.slane %v1807_v30, %v2089_v8  ;;  %v1802_v50 = vld [vmem:[%s3048_s3 + $0x1] ss:$8 sm:$0xf]  ;;  %s2021_s22 = smov 112   ;;  %s2022_s25 = smov 111   ;;  %vm575_vm1 = vcmask 138240  }
   0xa   :  { %567 = vrot.lane.b32.xlu0 %v554_v16, %s2015_s21  ;;  %v435_v36 = vrot.slane %v1805_v35, %v2101_v13  ;;  %v431_v37 = vrot.slane %v1805_v35, %v2094_v10  ;;  %v443_v38 = vrot.slane %v1805_v35, %v2096_v11  ;;  %v439_v39 = vrot.slane %v1805_v35, %v2089_v8  ;;  %v257_v55 = vld [vmem:[%s3048_s3] ss:$8 sm:$0xf]  ;;  %s2023_s1 = smov 94   ;;  %s2025_s30 = smov 95  }
   0xb   :  { %105 = vmatpush1.bf16.msra.mxu0 %v2006_v14  ;;  %v348_v41 = vrot.slane %v1803_v40, %v2101_v13  ;;  %v344_v42 = vrot.slane %v1803_v40, %v2094_v10  ;;  %v356_v43 = vrot.slane %v1803_v40, %v2096_v11  ;;  %v352_v44 = vrot.slane %v1803_v40, %v2089_v8  ;;  %v1791_v60 = vld [vmem:[%s3050_s0 + $0x8] sm:$0xff]  ;;  %v32_v61 = vld [vmem:[%s3050_s0] sm:$0xff]  ;;  %s2024_s0 = smov 96   ;;  %s2026_s10 = smov 110  }
   0xc   :  { %215 = vmatpush1.bf16.msra.mxu1 %v2006_v14  ;;  %106 = vmatprep.subr.bf16.mxu0 %v2007_v17  ;;  %v389_v46 = vrot.slane %v1804_v45, %v2101_v13  ;;  %v385_v47 = vrot.slane %v1804_v45, %v2094_v10  ;;  %v397_v48 = vrot.slane %v1804_v45, %v2096_v11  ;;  %s2027_s11 = smov 126   ;;  %vm493_vm2 = vcmask 121856  }
   0xd   :  { %216 = vmatprep.subr.bf16.mxu1 %v2007_v17  ;;  %573 = vrot.lane.b32.xlu1 %v566_v18, %s2015_s21  ;;  %v393_v49 = vrot.slane %v1804_v45, %v2089_v8  ;;  %v307_v51 = vrot.slane %v1802_v50, %v2101_v13  ;;  %v303_v52 = vrot.slane %v1802_v50, %v2094_v10  ;;  %vm534_vm3 = vcmask 130048  }
   0xe   :  { %569 = vrot.lane.b32.xlu0 %v558_v19, %s2015_s21  ;;  %v315_v53 = vrot.slane %v1802_v50, %v2096_v11  ;;  %v311_v54 = vrot.slane %v1802_v50, %v2089_v8  ;;  %v266_v56 = vrot.slane %v257_v55, %v2101_v13  ;;  %v262_v57 = vrot.slane %v257_v55, %v2094_v10 }
   0xf   :  { %107 = vmatpush1.bf16.msra.mxu0 %v2009_v21  ;;  %v274_v58 = vrot.slane %v257_v55, %v2096_v11  ;;  %v270_v59 = vrot.slane %v257_v55, %v2089_v8  ;;  %146 = vst [vmem:[#allocation2 + $0x10] sm:$0xf] %v1791_v60  ;;  %36 = vst [vmem:[#allocation2 + $0x28] sm:$0xf] %v32_v61  ;;  %v144_v62 = vcombine.high %v1791_v60, %v1791_v60  ;;  %vm452_vm4 = vcmask 7168  }
  0x10   :  { %217 = vmatpush1.bf16.msra.mxu1 %v2009_v21  ;;  %v34_v63 = vcombine.high %v32_v61, %v32_v61  ;;  %vm365_vm5 = vcmask 924672   ;;  %vm406_vm6 = vcmask 1039360   ;;  %vm324_vm7 = vcmask 916480  }
  0x11   :  { %487 = vrot.lane.b32.xlu1 %v476_v24, %s2016_s2  ;;  %147 = vst [vmem:[#allocation2 + $0x18] sm:$0xf] %v144_v62  ;;  %vm628_vm8 = vcmask 1031168   ;;  %vm772_vm9 = vcmask 769024   ;;  %vm747_vm10 = vcmask 777216   ;;  %vm722_vm11 = vcmask 785408  }
  0x12   :  { %485 = vrot.lane.b32.xlu0 %v472_v25, %s2016_s2  ;;  %1790 = vmatmul.mubr.msk.bf16.vlgmr.msra.gmra.mxu0 %vm88_vm0, %v39_v26  ;;  %37 = vst [vmem:[#allocation2] sm:$0xf] %v34_v63  ;;  %vm697_vm12 = vcmask 900096   ;;  %vm283_vm13 = vcmask 908288   ;;  %vm929_vm14 = vcmask 654336  }
  0x13   :  { %1801 = vmatmul.mubr.msk.bf16.vlgmr.msra.gmra.mxu1 %vm88_vm0, %v150_v27  ;;  %965 = vmatprep.mubr.bf16.mxu0 %v2013_v2 }
  0x14   :  { %1006 = vmatprep.mubr.bf16.mxu1 %v2013_v2 }
  0x15   :  { %491 = vrot.lane.b32.xlu1 %v484_v28, %s2016_s2 }
  0x16   :  { %489 = vrot.lane.b32.xlu0 %v480_v29, %s2016_s2 }
  0x19   :  { %528 = vrot.lane.b32.xlu1 %v517_v31, %s2017_s9 }
  0x1a   :  { %526 = vrot.lane.b32.xlu0 %v513_v32, %s2017_s9 }
  0x1d   :  { %532 = vrot.lane.b32.xlu1 %v525_v33, %s2017_s9 }
  0x1e   :  { %530 = vrot.lane.b32.xlu0 %v521_v34, %s2017_s9 }
  0x21   :  { %446 = vrot.lane.b32.xlu1 %v435_v36, %s2018_s12 }
  0x22   :  { %444 = vrot.lane.b32.xlu0 %v431_v37, %s2018_s12 }
  0x25   :  { %450 = vrot.lane.b32.xlu1 %v443_v38, %s2018_s12 }
  0x26   :  { %448 = vrot.lane.b32.xlu0 %v439_v39, %s2018_s12 }
  0x29   :  { %359 = vrot.lane.b32.xlu1 %v348_v41, %s2019_s15 }
  0x2a   :  { %357 = vrot.lane.b32.xlu0 %v344_v42, %s2019_s15 }
  0x2d   :  { %363 = vrot.lane.b32.xlu1 %v356_v43, %s2019_s15 }
  0x2e   :  { %361 = vrot.lane.b32.xlu0 %v352_v44, %s2019_s15 }
  0x31   :  { %400 = vrot.lane.b32.xlu1 %v389_v46, %s2020_s18 }
  0x32   :  { %398 = vrot.lane.b32.xlu0 %v385_v47, %s2020_s18 }
  0x35   :  { %404 = vrot.lane.b32.xlu1 %v397_v48, %s2020_s18 }
  0x36   :  { %402 = vrot.lane.b32.xlu0 %v393_v49, %s2020_s18 }
  0x39   :  { %318 = vrot.lane.b32.xlu1 %v307_v51, %s2021_s22 }
  0x3a   :  { %316 = vrot.lane.b32.xlu0 %v303_v52, %s2021_s22 }
  0x3d   :  { %322 = vrot.lane.b32.xlu1 %v315_v53, %s2021_s22 }
  0x3e   :  { %320 = vrot.lane.b32.xlu0 %v311_v54, %s2021_s22 }
  0x41   :  { %277 = vrot.lane.b32.xlu1 %v266_v56, %s2022_s25 }
  0x42   :  { %275 = vrot.lane.b32.xlu0 %v262_v57, %s2022_s25 }
  0x45   :  { %281 = vrot.lane.b32.xlu1 %v274_v58, %s2022_s25 }
  0x46   :  { %279 = vrot.lane.b32.xlu0 %v270_v59, %s2022_s25 }
  0x7b   :  { %v2211_v0 = vpop.permute.xlu1 %571 }
  0x7c   :  { %v2213_v1 = vpop.permute.xlu0 %567 }
  0x7f   :  { %v574_v4 = vpop.permute.xlu1 %573 }
  0x80   :  { %v570_v5 = vpop.permute.xlu0 %569  ;;  %v588_v6 = vmul.f32 0.0, %v574_v4  ;;  %v578_v49 = vsel %vm575_vm1, %v2211_v0, %v574_v4 }
  0x81   :  { %v576_v50 = vsel %vm575_vm1, %v2213_v1, %v570_v5  ;;  %v577_v53 = vsel %vm575_vm1, %v570_v5, %v2211_v0 }
  0x82   :  { %770 = vrot.lane.b32.xlu0 %v588_v6, %s2023_s1 }
  0x83   :  { %v2216_v7 = vpop.permute.xlu1 %487 }
  0x84   :  { %v2218_v9 = vpop.permute.xlu0 %485 }
  0x85   :  { %v494_v58 = vsel %vm493_vm2, %v2218_v9, %v2216_v7 }
  0x87   :  { %v2220_v12 = vpop.permute.xlu1 %491 }
  0x88   :  { %v2222_v14 = vpop.permute.xlu0 %489  ;;  %v506_v15 = vmul.f32 0.0, %v2220_v12 }
  0x89   :  { %v496_v59 = vsel %vm493_vm2, %v2222_v14, %v2220_v12 }
  0x8a   :  { %720 = vrot.lane.b32.xlu1 %v506_v15, %s2024_s0 }
  0x8b   :  { %v2226_v16 = vpop.permute.xlu1 %528 }
  0x8c   :  { %v2228_v17 = vpop.permute.xlu0 %526 }
  0x8d   :  { %v535_v6 = vsel %vm534_vm3, %v2228_v17, %v2226_v16 }
  0x8f   :  { %v2230_v18 = vpop.permute.xlu1 %532 }
  0x90   :  { %v2232_v19 = vpop.permute.xlu0 %530  ;;  %v547_v20 = vmul.f32 0.0, %v2230_v18 }
  0x91   :  { %v537_v12 = vsel %vm534_vm3, %v2232_v19, %v2230_v18 }
  0x92   :  { %745 = vrot.lane.b32.xlu0 %v547_v20, %s2025_s30 }
  0x93   :  { %v2236_v21 = vpop.permute.xlu1 %446 }
  0x94   :  { %v2238_v22 = vpop.permute.xlu0 %444 }
  0x97   :  { %v2240_v23 = vpop.permute.xlu1 %450 }
  0x98   :  { %v2242_v24 = vpop.permute.xlu0 %448  ;;  %v465_v25 = vmul.f32 0.0, %v2240_v23 }
  0x9a   :  { %695 = vrot.lane.b32.xlu1 %v465_v25, %s2026_s10 }
  0x9b   :  { %v2256_v41 = vpop.permute.xlu1 %359 }
  0x9c   :  { %v2246_v26 = vpop.permute.xlu0 %357 }
  0x9d   :  { %v374_v27 = vmul.f32 0.0, %v2246_v26 }
  0x9f   :  { %618 = vrot.lane.b32.xlu0 %v374_v27, %s2027_s11  ;;  %v364_v44 = vpop.permute.xlu1 %363 }
  0xa0   :  { %v2250_v28 = vpop.permute.xlu0 %361 }
  0xa3   :  { %v401_v60 = vpop.permute.xlu1 %400 }
  0xa4   :  { %v2252_v29 = vpop.permute.xlu0 %398 }
  0xa5   :  { %v415_v30 = vmul.f32 0.0, %v2252_v29 }
  0xa7   :  { %643 = vrot.lane.b32.xlu1 %v415_v30, %s2021_s22  ;;  %v405_v27 = vpop.permute.xlu1 %404 }
  0xa8   :  { %v403_v15 = vpop.permute.xlu0 %402 }
  0xd2   :  { %v126_v31 = vpop.f32.mrf.mxu0 }
  0xd3   :  { %v236_v32 = vpop.f32.mrf.mxu1  ;;  %v135_v33 = vrot.slane %v126_v31, 4  ;;  %v453_v31 = vsel %vm452_vm4, %v2238_v22, %v2236_v21 }
  0xd4   :  { %v245_v34 = vrot.slane %v236_v32, 4  ;;  %v128_v35 = vpop.f32.mrf.mxu0  ;;  %v455_v32 = vsel %vm452_vm4, %v2242_v24, %v2240_v23 }
  0xd5   :  { %v238_v36 = vpop.f32.mrf.mxu1  ;;  %139 = vst [vmem:[#allocation2 + $0x28] sm:$0xf0] %v135_v33  ;;  %v136_v37 = vrot.slane %v128_v35, 4  ;;  %v368_v35 = vsel %vm365_vm5, %v2250_v28, %v364_v44 }
  0xd6   :  { %249 = vst [vmem:[#allocation2 + $0x10] sm:$0xf0] %v245_v34  ;;  %v246_v38 = vrot.slane %v238_v36, 4  ;;  %v130_v39 = vpop.f32.mrf.mxu0  ;;  %v317_v36 = vpop.permute.xlu0 %316 }
  0xd7   :  { %v240_v40 = vpop.f32.mrf.mxu1  ;;  %140 = vst [vmem:[#allocation2] sm:$0xf0] %v136_v37 }
  0xd8   :  { %250 = vst [vmem:[#allocation2 + $0x18] sm:$0xf0] %v246_v38  ;;  %v131_v42 = vpop.f32.mrf.mxu0  ;;  %v367_v38 = vsel %vm365_vm5, %v2256_v41, %v2250_v28 }
  0xd9   :  { %v241_v43 = vpop.f32.mrf.mxu1 }
  0xda   :  { %v366_v43 = vsel %vm365_vm5, %v2246_v26, %v2256_v41 }
  0xdc   :  { %v2260_v46 = vld [vmem:[#allocation2 + $0x28] sm:$0xff] }
  0xdd   :  { %v2258_v45 = vld [vmem:[#allocation2 + $0x10] sm:$0xff]  ;;  %v584_v56 = vmul.f32 %v2213_v1, %v2260_v46  ;;  %v495_v1 = vsel %vm493_vm2, %v2216_v7, %v2222_v14  ;;  %v502_v5 = vmul.f32 %v2218_v9, %v2260_v46  ;;  %v536_v9 = vsel %vm534_vm3, %v2226_v16, %v2232_v19 }
  0xde   :  { %v2264_v48 = vld [vmem:[#allocation2] sm:$0xff]  ;;  %v586_v57 = vmul.f32 %v577_v53, %v2258_v45  ;;  %v504_v4 = vmul.f32 %v495_v1, %v2258_v45  ;;  %v543_v18 = vmul.f32 %v2228_v17, %v2260_v46  ;;  %v545_v30 = vmul.f32 %v536_v9, %v2258_v45 }
  0xdf   :  { %v2262_v47 = vld [vmem:[#allocation2 + $0x18] sm:$0xff]  ;;  %v1837_v52 = vpack.i.bf16 %v2264_v48, %v2260_v46  ;;  %v585_v54 = vmul.f32 %v576_v50, %v2264_v48  ;;  %v503_v0 = vmul.f32 %v494_v58, %v2264_v48  ;;  %v544_v20 = vmul.f32 %v535_v6, %v2264_v48 }
  0xe0   :  { %v1842_v51 = vpack.i.bf16 %v2262_v47, %v2258_v45  ;;  %v587_v55 = vmul.f32 %v578_v49, %v2262_v47  ;;  %v505_v63 = vmul.f32 %v496_v59, %v2262_v47  ;;  %v546_v25 = vmul.f32 %v537_v12, %v2262_v47 }
  0xe1   :  { %1838 = vrot.lane.b32.xlu1 %v1837_v52, %s2022_s25  ;;  %v1847_v61 = vpack.i.bf16 %v585_v54, %v584_v56  ;;  %v1857_v14 = vpack.i.bf16 %v503_v0, %v502_v5  ;;  %v1867_v33 = vpack.i.bf16 %v544_v20, %v543_v18  ;;  %v464_v19 = vmul.f32 %v455_v32, %v2262_v47  ;;  %v321_v52 = vpop.permute.xlu0 %320 }
  0xe2   :  { %1843 = vrot.lane.b32.xlu0 %v1842_v51, %s2022_s25  ;;  %v1852_v62 = vpack.i.bf16 %v587_v55, %v586_v57  ;;  %v1862_v7 = vpack.i.bf16 %v505_v63, %v504_v4  ;;  %v1872_v16 = vpack.i.bf16 %v546_v25, %v545_v30  ;;  %v462_v34 = vmul.f32 %v453_v31, %v2264_v48 }
  0xe3   :  { %v454_v17 = vsel %vm452_vm4, %v2236_v21, %v2242_v24  ;;  %v461_v37 = vmul.f32 %v2238_v22, %v2260_v46  ;;  %v378_v21 = vmul.f32 %v364_v44, %v2262_v47  ;;  %v319_v24 = vpop.permute.xlu1 %318  ;;  %v376_v42 = vmul.f32 %v367_v38, %v2264_v48 }
  0xe4   :  { %v463_v23 = vmul.f32 %v454_v17, %v2258_v45  ;;  %v407_v49 = vsel %vm406_vm6, %v2252_v29, %v401_v60  ;;  %v408_v22 = vsel %vm406_vm6, %v401_v60, %v403_v15  ;;  %v377_v50 = vmul.f32 %v368_v35, %v2258_v45 }
  0xe5   :  { %1853 = vrot.lane.b32.xlu1 %v1852_v62, %s2023_s1  ;;  %v1877_v40 = vpack.i.bf16 %v462_v34, %v461_v37  ;;  %v375_v28 = vmul.f32 %v366_v43, %v2260_v46  ;;  %v409_v44 = vsel %vm406_vm6, %v403_v15, %v405_v27  ;;  %v419_v26 = vmul.f32 %v405_v27, %v2262_v47  ;;  %v2369_v12 = vpop.permute.xlu0 %275 }
  0xe6   :  { %1848 = vrot.lane.b32.xlu0 %v1847_v61, %s2023_s1  ;;  %v1882_v39 = vpack.i.bf16 %v464_v19, %v463_v23  ;;  %v1892_v51 = vpack.i.bf16 %v378_v21, %v377_v50  ;;  %v416_v29 = vmul.f32 %v407_v49, %v2260_v46  ;;  %v417_v41 = vmul.f32 %v408_v22, %v2264_v48 }
  0xe7   :  { %v1887_v53 = vpack.i.bf16 %v376_v42, %v375_v28  ;;  %v325_v54 = vsel %vm324_vm7, %v317_v36, %v319_v24  ;;  %v326_v55 = vsel %vm324_vm7, %v319_v24, %v321_v52  ;;  %v323_v56 = vpop.permute.xlu1 %322  ;;  %v418_v57 = vmul.f32 %v409_v44, %v2258_v45 }
  0xe8   :  { %v327_v58 = vsel %vm324_vm7, %v321_v52, %v323_v56  ;;  %v337_v59 = vmul.f32 %v323_v56, %v2262_v47  ;;  %v1897_v61 = vpack.i.bf16 %v417_v41, %v416_v29  ;;  %v334_v62 = vmul.f32 %v325_v54, %v2260_v46 }
  0xe9   :  { %1858 = vrot.lane.b32.xlu1 %v1857_v14, %s2024_s0  ;;  %v1902_v60 = vpack.i.bf16 %v419_v26, %v418_v57  ;;  %v335_v63 = vmul.f32 %v326_v55, %v2264_v48  ;;  %v336_v0 = vmul.f32 %v327_v58, %v2258_v45  ;;  %v333_v5 = vmul.f32 0.0, %v317_v36 }
  0xea   :  { %1863 = vrot.lane.b32.xlu0 %v1862_v7, %s2024_s0  ;;  %v2373_v7 = vpop.permute.xlu0 %279 }
  0xeb   :  { %v1912_v1 = vpack.i.bf16 %v337_v59, %v336_v0  ;;  %v1907_v4 = vpack.i.bf16 %v335_v63, %v334_v62  ;;  %v2367_v6 = vpop.permute.xlu1 %277 }
  0xed   :  { %1873 = vrot.lane.b32.xlu1 %v1872_v16, %s2025_s30 }
  0xee   :  { %1868 = vrot.lane.b32.xlu0 %v1867_v33, %s2025_s30 }
  0xef   :  { %v2371_v15 = vpop.permute.xlu1 %281 }
  0xf1   :  { %1878 = vrot.lane.b32.xlu1 %v1877_v40, %s2026_s10 }
  0xf2   :  { %1883 = vrot.lane.b32.xlu0 %v1882_v39, %s2026_s10 }
  0xf4   :  { %v771_v20 = vpop.permute.xlu0 %770 }
  0xf5   :  { %1893 = vrot.lane.b32.xlu1 %v1892_v51, %s2027_s11 }
  0xf6   :  { %1888 = vrot.lane.b32.xlu0 %v1887_v53, %s2027_s11 }
  0xf9   :  { %1903 = vrot.lane.b32.xlu1 %v1902_v60, %s2021_s22 }
  0xfa   :  { %1898 = vrot.lane.b32.xlu0 %v1897_v61, %s2021_s22 }
  0xfc   :  { %v2375_v14 = vpop.permute.xlu1 %720 }
  0xfd   :  { %1913 = vrot.lane.b32.xlu1 %v1912_v1, %s2020_s18 }
  0xfe   :  { %1908 = vrot.lane.b32.xlu0 %v1907_v4, %s2020_s18 }
 0x102   :  { %594 = vrot.lane.b32.xlu0 %v333_v5, %s2020_s18 }
 0x104   :  { %v2379_v9 = vpop.permute.xlu0 %745 }
 0x10c   :  { %v2377_v25 = vpop.permute.xlu1 %695 }
 0x111   :  { %v619_v18 = vpop.permute.xlu0 %618 }
 0x119   :  { %v644_v27 = vpop.permute.xlu1 %643 }
 0x153   :  { %v2383_v31 = vpop.permute.xlu1 %1838 }
 0x154   :  { %v2381_v30 = vpop.permute.xlu0 %1843  ;;  %v1840_v39 = vunpack.i.l.bf16 %v2383_v31 }
 0x157   :  { %v1854_v33 = vpop.permute.xlu1 %1853 }
 0x158   :  { %v1849_v32 = vpop.permute.xlu0 %1848  ;;  %v1855_v51 = vunpack.i.l.bf16 %v1854_v33  ;;  %v1856_v55 = vunpack.i.h.bf16 %v1854_v33 }
 0x159   :  { %v1850_v16 = vunpack.i.l.bf16 %v1849_v32  ;;  %v1851_v50 = vunpack.i.h.bf16 %v1849_v32 }
 0x15a   :  { %v775_v63 = vsel %vm772_vm9, %v1855_v51, %v1856_v55  ;;  %v776_v0 = vsel %vm772_vm9, %v1856_v55, %v771_v20  ;;  %v1846_v55 = vunpack.i.h.bf16 %v2381_v30 }
 0x15b   :  { %v802_v19 = vpack.c.bf16 %v2014_v3, %v1850_v16  ;;  %v1859_v17 = vpop.permute.xlu1 %1858  ;;  %v773_v57 = vsel %vm772_vm9, %v1850_v16, %v1851_v50  ;;  %v774_v58 = vsel %vm772_vm9, %v1851_v50, %v1855_v51  ;;  %v805_v5 = vpack.c.bf16 %v2014_v3, %v775_v63 }
 0x15c   :  { %v2386_v34 = vpop.permute.xlu0 %1863  ;;  %v1860_v23 = vunpack.i.l.bf16 %v1859_v17  ;;  %v803_v59 = vpack.c.bf16 %v2014_v3, %v773_v57  ;;  %v804_v62 = vpack.c.bf16 %v2014_v3, %v774_v58  ;;  %v1861_v4 = vunpack.i.h.bf16 %v1859_v17 }
 0x15d   :  { %878 = vrot.lane.b32.xlu1 %v802_v19, %s2015_s21  ;;  %v1865_v1 = vunpack.i.l.bf16 %v2386_v34  ;;  %v1866_v20 = vunpack.i.h.bf16 %v2386_v34  ;;  %v1841_v34 = vunpack.i.h.bf16 %v2383_v31 }
 0x15e   :  { %v723_v17 = vsel %vm722_vm11, %v1860_v23, %v1861_v4 }
 0x15f   :  { %v1874_v36 = vpop.permute.xlu1 %1873  ;;  %v724_v16 = vsel %vm722_vm11, %v1861_v4, %v1865_v1  ;;  %v725_v51 = vsel %vm722_vm11, %v1865_v1, %v1866_v20 }
 0x160   :  { %v1869_v35 = vpop.permute.xlu0 %1868  ;;  %v1875_v61 = vunpack.i.l.bf16 %v1874_v36 }
 0x161   :  { %v1870_v37 = vunpack.i.l.bf16 %v1869_v35  ;;  %v1871_v60 = vunpack.i.h.bf16 %v1869_v35 }
 0x163   :  { %v797_v38 = vpack.c.bf16 %v1870_v37, %v1860_v23  ;;  %v2391_v24 = vpop.permute.xlu1 %1878  ;;  %v749_v32 = vsel %vm747_vm10, %v1871_v60, %v1875_v61  ;;  %v748_v33 = vsel %vm747_vm10, %v1870_v37, %v1871_v60  ;;  %v726_v23 = vsel %vm722_vm11, %v1866_v20, %v2375_v14 }
 0x164   :  { %v2389_v21 = vpop.permute.xlu0 %1883  ;;  %v1880_v40 = vunpack.i.l.bf16 %v2391_v24  ;;  %v799_v19 = vpack.c.bf16 %v749_v32, %v724_v16  ;;  %v1881_v35 = vunpack.i.h.bf16 %v2391_v24  ;;  %v674_v14 = vsel %vm283_vm13, %v1840_v39, %v1841_v34 }
 0x165   :  { %868 = vrot.lane.b32.xlu0 %v797_v38, %s2015_s21  ;;  %v1885_v38 = vunpack.i.l.bf16 %v2389_v21 }
 0x166   :  { %v792_v42 = vpack.c.bf16 %v1880_v40, %v1840_v39 }
 0x167   :  { %v2400_v43 = vpop.permute.xlu1 %1893 }
 0x168   :  { %v2402_v49 = vpop.permute.xlu0 %1888  ;;  %858 = vrot.lane.b32.xlu1 %v792_v42, %s2015_s21  ;;  %v1896_v52 = vunpack.i.h.bf16 %v2400_v43  ;;  %v1845_v42 = vunpack.i.l.bf16 %v2381_v30  ;;  %v1895_v31 = vunpack.i.l.bf16 %v2400_v43 }
 0x169   :  { %v1890_v22 = vunpack.i.l.bf16 %v2402_v49  ;;  %v1891_v39 = vunpack.i.h.bf16 %v2402_v49  ;;  %v285_v49 = vsel %vm283_vm13, %v2367_v6, %v2373_v7 }
 0x16a   :  { %v676_v60 = vsel %vm283_vm13, %v1845_v42, %v1846_v55 }
 0x16b   :  { %v2406_v28 = vpop.permute.xlu1 %1903  ;;  %v629_v41 = vsel %vm628_vm8, %v619_v18, %v1890_v22  ;;  %v806_v18 = vpack.c.bf16 %v2014_v3, %v776_v0  ;;  %v630_v32 = vsel %vm628_vm8, %v1890_v22, %v1891_v39 }
 0x16c   :  { %v2408_v44 = vpop.permute.xlu0 %1898  ;;  %v1906_v53 = vunpack.i.h.bf16 %v2406_v28  ;;  %v1905_v24 = vunpack.i.l.bf16 %v2406_v28 }
 0x16d   :  { %v1900_v26 = vunpack.i.l.bf16 %v2408_v44 }
 0x16e   :  { %v791_v29 = vpack.c.bf16 %v1906_v53, %v1896_v52 }
 0x16f   :  { %v653_v54 = vsel %vm324_vm7, %v644_v27, %v1900_v26  ;;  %v1876_v27 = vunpack.i.h.bf16 %v1874_v36  ;;  %v798_v36 = vpack.c.bf16 %v748_v33, %v723_v17  ;;  %v1914_v4 = vpop.permute.xlu1 %1913  ;;  %v286_v17 = vsel %vm283_vm13, %v2373_v7, %v2371_v15 }
 0x170   :  { %v787_v56 = vpack.c.bf16 %v653_v54, %v629_v41  ;;  %856 = vrot.lane.b32.xlu1 %v791_v29, %s2015_s21  ;;  %v698_v41 = vsel %vm697_vm12, %v1880_v40, %v1881_v35  ;;  %v699_v54 = vsel %vm697_vm12, %v1881_v35, %v1885_v38  ;;  %v1901_v40 = vunpack.i.h.bf16 %v2408_v44 }
 0x171   :  { %v751_v3 = vsel %vm747_vm10, %v1876_v27, %v2379_v9  ;;  %v750_v37 = vsel %vm747_vm10, %v1875_v61, %v1876_v27  ;;  %v1886_v9 = vunpack.i.h.bf16 %v2389_v21  ;;  %v675_v21 = vsel %vm283_vm13, %v1841_v34, %v1845_v42  ;;  %v1815_v42 = vld [vmem:[%s3048_s3 + $0x5] ss:$8 sm:$0xf] }
 0x172   :  { %848 = vrot.lane.b32.xlu0 %v787_v56, %s2015_s21  ;;  %v801_v50 = vpack.c.bf16 %v751_v3, %v726_v23  ;;  %v800_v29 = vpack.c.bf16 %v750_v37, %v725_v51  ;;  %v793_v56 = vpack.c.bf16 %v698_v41, %v674_v14  ;;  %v794_v57 = vpack.c.bf16 %v699_v54, %v675_v21  ;;  %v1817_v37 = vld [vmem:[%s3048_s3 + $0x7] ss:$8 sm:$0xf]  ;;  %v1816_v41 = vld [vmem:[%s3048_s3 + $0x6] ss:$8 sm:$0xf] }
 0x173   :  { %v700_v58 = vsel %vm697_vm12, %v1885_v38, %v1886_v9  ;;  %v701_v30 = vsel %vm697_vm12, %v1886_v9, %v2377_v25  ;;  %v655_v1 = vsel %vm324_vm7, %v1901_v40, %v1905_v24  ;;  %v654_v25 = vsel %vm324_vm7, %v1900_v26, %v1901_v40  ;;  %v1814_v21 = vld [vmem:[%s3048_s3 + $0x4] ss:$8 sm:$0xf] }
 0x174   :  { %880 = vrot.lane.b32.xlu1 %v803_v59, %s2015_s21  ;;  %v1909_v59 = vpop.permute.xlu0 %1908  ;;  %v795_v61 = vpack.c.bf16 %v700_v58, %v676_v60  ;;  %v796_v0 = vpack.c.bf16 %v701_v30, %v1846_v55  ;;  %v631_v27 = vsel %vm628_vm8, %v1891_v39, %v1895_v31  ;;  %v1916_v33 = vunpack.i.h.bf16 %v1914_v4 }
 0x175   :  { %v1910_v63 = vunpack.i.l.bf16 %v1909_v59  ;;  %v1915_v20 = vunpack.i.l.bf16 %v1914_v4  ;;  %v788_v16 = vpack.c.bf16 %v654_v25, %v630_v32  ;;  %v294_v38 = vmul.f32 %v285_v49, %v2264_v48  ;;  %v1811_v4 = vld [vmem:[%s3048_s3 + $0x1] ss:$8 sm:$0xf] }
 0x176   :  { %882 = vrot.lane.b32.xlu0 %v804_v62, %s2015_s21  ;;  %v1911_v62 = vunpack.i.h.bf16 %v1909_v59  ;;  %v1312_v23 = vrot.slane %v1817_v37, %v2094_v10  ;;  %v1234_v51 = vrot.slane %v1815_v42, %v2094_v10  ;;  %v1238_v9 = vrot.slane %v1815_v42, %v2101_v13  ;;  %v1812_v59 = vld [vmem:[%s3048_s3 + $0x2] ss:$8 sm:$0xf] }
 0x177   :  { %v607_v28 = vsel %vm406_vm6, %v1915_v20, %v1916_v33  ;;  %v1246_v54 = vrot.slane %v1815_v42, %v2096_v11  ;;  %v1273_v55 = vrot.slane %v1816_v41, %v2094_v10  ;;  %v1277_v14 = vrot.slane %v1816_v41, %v2101_v13 }
 0x178   :  { %884 = vrot.lane.b32.xlu1 %v805_v5, %s2015_s21  ;;  %v284_v5 = vsel %vm283_vm13, %v2369_v12, %v2367_v6  ;;  %v605_v44 = vsel %vm406_vm6, %v1910_v63, %v1911_v62  ;;  %v606_v3 = vsel %vm406_vm6, %v1911_v62, %v1915_v20  ;;  %v1195_v40 = vrot.slane %v1814_v21, %v2094_v10 }
 0x179   :  { %v293_v26 = vmul.f32 %v284_v5, %v2260_v46  ;;  %v632_v46 = vsel %vm628_vm8, %v1895_v31, %v1896_v52  ;;  %v784_v43 = vpack.c.bf16 %v606_v3, %v294_v38  ;;  %v292_v52 = vmul.f32 0.0, %v2369_v12  ;;  %v807_v12 = vld [vmem:[%s3051_s5] sm:$0xff] }
 0x17a   :  { %886 = vrot.lane.b32.xlu0 %v806_v18, %s2015_s21  ;;  %v789_v18 = vpack.c.bf16 %v655_v1, %v631_v27  ;;  %v1203_v58 = vrot.slane %v1814_v21, %v2089_v8  ;;  %v1207_v30 = vrot.slane %v1814_v21, %v2096_v11  ;;  %v1112_v31 = vrot.slane %v1812_v59, %v2094_v10 }
 0x17b   :  { %v783_v22 = vpack.c.bf16 %v605_v44, %v293_v26  ;;  %v1116_v39 = vrot.slane %v1812_v59, %v2101_v13  ;;  %v1120_v60 = vrot.slane %v1812_v59, %v2089_v8  ;;  %v1124_v62 = vrot.slane %v1812_v59, %v2096_v11 }
 0x17c   :  { %872 = vrot.lane.b32.xlu1 %v799_v19, %s2015_s21  ;;  %v656_v19 = vsel %vm324_vm7, %v1905_v24, %v1906_v53  ;;  %v295_v53 = vmul.f32 %v286_v17, %v2258_v45  ;;  %v296_v45 = vmul.f32 %v2371_v15, %v2262_v47  ;;  %v1316_v47 = vrot.slane %v1817_v37, %v2101_v13 }
 0x17d   :  { %v790_v35 = vpack.c.bf16 %v656_v19, %v632_v46  ;;  %v1320_v15 = vrot.slane %v1817_v37, %v2089_v8  ;;  %v1285_v24 = vrot.slane %v1816_v41, %v2096_v11  ;;  %v1073_v5 = vrot.slane %v1811_v4, %v2094_v10 }
 0x17e   :  { %870 = vrot.lane.b32.xlu0 %v798_v36, %s2015_s21  ;;  %v595_v36 = vpop.permute.xlu0 %594  ;;  %v785_v6 = vpack.c.bf16 %v607_v28, %v295_v53  ;;  %v786_v34 = vpack.c.bf16 %v1916_v33, %v296_v45  ;;  %v1077_v27 = vrot.slane %v1811_v4, %v2101_v13  ;;  %v1085_v32 = vrot.slane %v1811_v4, %v2096_v11 }
 0x17f   :  { %v604_v7 = vsel %vm406_vm6, %v595_v36, %v1910_v63 }
 0x180   :  { %876 = vrot.lane.b32.xlu1 %v801_v50, %s2015_s21  ;;  %v782_v48 = vpack.c.bf16 %v604_v7, %v292_v52  ;;  %v1324_v50 = vrot.slane %v1817_v37, %v2096_v11 }
 0x182   :  { %874 = vrot.lane.b32.xlu0 %v800_v29, %s2015_s21  ;;  %v1242_v29 = vrot.slane %v1815_v42, %v2089_v8 }
 0x184   :  { %860 = vrot.lane.b32.xlu1 %v793_v56, %s2015_s21  ;;  %v1281_v56 = vrot.slane %v1816_v41, %v2089_v8 }
 0x186   :  { %862 = vrot.lane.b32.xlu0 %v794_v57, %s2015_s21  ;;  %v1199_v57 = vrot.slane %v1814_v21, %v2101_v13 }
 0x188   :  { %864 = vrot.lane.b32.xlu1 %v795_v61, %s2015_s21  ;;  %v1813_v61 = vld [vmem:[%s3048_s3 + $0x3] ss:$8 sm:$0xf] }
 0x189   :  { %v1151_v63 = vrot.slane %v1813_v61, %v2094_v10  ;;  %v1159_v1 = vrot.slane %v1813_v61, %v2089_v8  ;;  %v1163_v25 = vrot.slane %v1813_v61, %v2096_v11 }
 0x18a   :  { %866 = vrot.lane.b32.xlu0 %v796_v0, %s2015_s21  ;;  %v1155_v0 = vrot.slane %v1813_v61, %v2101_v13 }
 0x18c   :  { %852 = vrot.lane.b32.xlu1 %v789_v18, %s2015_s21  ;;  %v1081_v18 = vrot.slane %v1811_v4, %v2089_v8 }
 0x18e   :  { %850 = vrot.lane.b32.xlu0 %v788_v16, %s2015_s21 }
 0x190   :  { %840 = vrot.lane.b32.xlu1 %v783_v22, %s2015_s21 }
 0x192   :  { %854 = vrot.lane.b32.xlu0 %v790_v35, %s2015_s21 }
 0x194   :  { %844 = vrot.lane.b32.xlu1 %v785_v6, %s2015_s21 }
 0x196   :  { %842 = vrot.lane.b32.xlu0 %v784_v43, %s2015_s21 }
 0x198   :  { %838 = vrot.lane.b32.xlu1 %v782_v48, %s2015_s21 }
 0x19a   :  { %846 = vrot.lane.b32.xlu0 %v786_v34, %s2015_s21 }
 0x19c   :  { %1325 = vrot.lane.b32.xlu1 %v1312_v23, %s2015_s21 }
 0x19e   :  { %810 = vperm.xlu0 %1917, %v807_v12  }
 0x1a0   :  { %1327 = vrot.lane.b32.xlu1 %v1316_v47, %s2015_s21 }
 0x1a2   :  { %1329 = vrot.lane.b32.xlu0 %v1320_v15, %s2015_s21 }
 0x1a4   :  { %1331 = vrot.lane.b32.xlu1 %v1324_v50, %s2015_s21 }
 0x1a6   :  { %1247 = vrot.lane.b32.xlu0 %v1234_v51, %s2016_s2 }
 0x1a8   :  { %1249 = vrot.lane.b32.xlu1 %v1238_v9, %s2016_s2 }
 0x1aa   :  { %1251 = vrot.lane.b32.xlu0 %v1242_v29, %s2016_s2 }
 0x1ac   :  { %1253 = vrot.lane.b32.xlu1 %v1246_v54, %s2016_s2 }
 0x1ae   :  { %1286 = vrot.lane.b32.xlu0 %v1273_v55, %s2017_s9 }
 0x1b0   :  { %1288 = vrot.lane.b32.xlu1 %v1277_v14, %s2017_s9 }
 0x1b2   :  { %1290 = vrot.lane.b32.xlu0 %v1281_v56, %s2017_s9 }
 0x1b4   :  { %1292 = vrot.lane.b32.xlu1 %v1285_v24, %s2017_s9 }
 0x1b6   :  { %1208 = vrot.lane.b32.xlu0 %v1195_v40, %s2018_s12 }
 0x1b8   :  { %1210 = vrot.lane.b32.xlu1 %v1199_v57, %s2018_s12 }
 0x1ba   :  { %1212 = vrot.lane.b32.xlu0 %v1203_v58, %s2018_s12 }
 0x1bc   :  { %1214 = vrot.lane.b32.xlu1 %v1207_v30, %s2018_s12  ;;  %v251_v30 = vld [vmem:[%s3052_s4] sm:$0xf] }
 0x1be   :  { %1125 = vrot.lane.b32.xlu0 %v1112_v31, %s2019_s15 }
 0x1c0   :  { %1127 = vrot.lane.b32.xlu1 %v1116_v39, %s2019_s15 }
 0x1c2   :  { %1129 = vrot.lane.b32.xlu0 %v1120_v60, %s2019_s15 }
 0x1c4   :  { %1131 = vrot.lane.b32.xlu1 %v1124_v62, %s2019_s15  ;;  %v2631_v62 = vld [vmem:[#allocation2 + $0x8] sm:$0xff] }
 0x1c6   :  { %1164 = vrot.lane.b32.xlu0 %v1151_v63, %s2020_s18 }
 0x1c8   :  { %1166 = vrot.lane.b32.xlu1 %v1155_v0, %s2020_s18 }
 0x1ca   :  { %1168 = vrot.lane.b32.xlu0 %v1159_v1, %s2020_s18 }
 0x1cc   :  { %1170 = vrot.lane.b32.xlu1 %v1163_v25, %s2020_s18 }
 0x1ce   :  { %1086 = vrot.lane.b32.xlu0 %v1073_v5, %s2021_s22 }
 0x1cf   :  { %v879_v33 = vpop.permute.xlu1 %878 }
 0x1d0   :  { %1088 = vrot.lane.b32.xlu1 %v1077_v27, %s2021_s22 }
 0x1d2   :  { %1090 = vrot.lane.b32.xlu0 %v1081_v18, %s2021_s22 }
 0x1d4   :  { %1092 = vrot.lane.b32.xlu1 %v1085_v32, %s2021_s22 }
 0x1d7   :  { %v869_v16 = vpop.permute.xlu0 %868 }
 0x1da   :  { %v859_v20 = vpop.permute.xlu1 %858 }
 0x1e2   :  { %v857_v44 = vpop.permute.xlu1 %856 }
 0x1e4   :  { %v849_v26 = vpop.permute.xlu0 %848 }
 0x1e6   :  { %v881_v19 = vpop.permute.xlu1 %880 }
 0x1e7   :  { %v905_v22 = vsel %vm575_vm1, %v879_v33, %v881_v19 }
 0x1e8   :  { %v883_v17 = vpop.permute.xlu0 %882 }
 0x1e9   :  { %v906_v49 = vsel %vm575_vm1, %v881_v19, %v883_v17 }
 0x1ea   :  { %939 = vmatprep.subr.bf16.mxu0 %v906_v49  ;;  %v885_v46 = vpop.permute.xlu1 %884 }
 0x1eb   :  { %940 = vmatpush1.bf16.msra.mxu0 %v905_v22  ;;  %v907_v53 = vsel %vm575_vm1, %v883_v17, %v885_v46 }
 0x1ec   :  { %v887_v35 = vpop.permute.xlu0 %886 }
 0x1ed   :  { %v908_v28 = vsel %vm575_vm1, %v885_v46, %v887_v35 }
 0x1ee   :  { %980 = vmatprep.subr.bf16.mxu1 %v908_v28  ;;  %v873_v36 = vpop.permute.xlu1 %872 }
 0x1ef   :  { %981 = vmatpush1.bf16.msra.mxu1 %v907_v53 }
 0x1f0   :  { %v871_v3 = vpop.permute.xlu0 %870 }
 0x1f1   :  { %v901_v38 = vsel %vm575_vm1, %v869_v16, %v871_v3  ;;  %v902_v6 = vsel %vm575_vm1, %v871_v3, %v873_v36 }
 0x1f2   :  { %941 = vmatprep.subr.bf16.mxu0 %v902_v6  ;;  %v877_v7 = vpop.permute.xlu1 %876 }
 0x1f3   :  { %942 = vmatpush1.bf16.msra.mxu0 %v901_v38 }
 0x1f4   :  { %v875_v43 = vpop.permute.xlu0 %874 }
 0x1f5   :  { %v903_v52 = vsel %vm575_vm1, %v873_v36, %v875_v43  ;;  %v904_v45 = vsel %vm575_vm1, %v875_v43, %v877_v7  ;;  %v1029_v7 = vld [vmem:[%s3048_s3] ss:$8 sm:$0xf] }
 0x1f6   :  { %982 = vmatprep.subr.bf16.mxu1 %v904_v45  ;;  %v861_v37 = vpop.permute.xlu1 %860 }
 0x1f7   :  { %983 = vmatpush1.bf16.msra.mxu1 %v903_v52  ;;  %v897_v23 = vsel %vm575_vm1, %v859_v20, %v861_v37  ;;  %v1034_v52 = vrot.slane %v1029_v7, %v2094_v10  ;;  %v1046_v10 = vrot.slane %v1029_v7, %v2096_v11 }
 0x1f8   :  { %v863_v48 = vpop.permute.xlu0 %862 }
 0x1f9   :  { %v898_v34 = vsel %vm575_vm1, %v861_v37, %v863_v48  ;;  %v1042_v37 = vrot.slane %v1029_v7, %v2089_v8 }
 0x1fa   :  { %943 = vmatprep.subr.bf16.mxu0 %v898_v34  ;;  %v865_v12 = vpop.permute.xlu1 %864 }
 0x1fb   :  { %944 = vmatpush1.bf16.msra.mxu0 %v897_v23  ;;  %v899_v42 = vsel %vm575_vm1, %v863_v48, %v865_v12  ;;  %v1038_v23 = vrot.slane %v1029_v7, %v2101_v13 }
 0x1fc   :  { %v867_v47 = vpop.permute.xlu0 %866 }
 0x1fd   :  { %v900_v15 = vsel %vm575_vm1, %v865_v12, %v867_v47 }
 0x1fe   :  { %984 = vmatprep.subr.bf16.mxu1 %v900_v15  ;;  %v853_v50 = vpop.permute.xlu1 %852 }
 0x1ff   :  { %985 = vmatpush1.bf16.msra.mxu1 %v899_v42 }
 0x200   :  { %v851_v51 = vpop.permute.xlu0 %850 }
 0x201   :  { %v893_v9 = vsel %vm575_vm1, %v849_v26, %v851_v51  ;;  %v894_v29 = vsel %vm575_vm1, %v851_v51, %v853_v50 }
 0x202   :  { %945 = vmatprep.subr.bf16.mxu0 %v894_v29  ;;  %v841_v41 = vpop.permute.xlu1 %840 }
 0x203   :  { %946 = vmatpush1.bf16.msra.mxu0 %v893_v9 }
 0x204   :  { %v855_v54 = vpop.permute.xlu0 %854 }
 0x205   :  { %v895_v55 = vsel %vm575_vm1, %v853_v50, %v855_v54  ;;  %v896_v14 = vsel %vm575_vm1, %v855_v54, %v857_v44 }
 0x206   :  { %986 = vmatprep.subr.bf16.mxu1 %v896_v14  ;;  %v845_v56 = vpop.permute.xlu1 %844 }
 0x207   :  { %987 = vmatpush1.bf16.msra.mxu1 %v895_v55 }
 0x208   :  { %v843_v21 = vpop.permute.xlu0 %842 }
 0x209   :  { %v890_v24 = vsel %vm575_vm1, %v841_v41, %v843_v21  ;;  %v891_v31 = vsel %vm575_vm1, %v843_v21, %v845_v56 }
 0x20a   :  { %947 = vmatprep.subr.bf16.mxu0 %v890_v24  ;;  %v839_v40 = vpop.permute.xlu1 %838 }
 0x20b   :  { %v889_v57 = vsel %vm575_vm1, %v839_v40, %v841_v41 }
 0x20c   :  { %v847_v58 = vpop.permute.xlu0 %846  ;;  %948 = vmatpush1.bf16.msra.mxu0 %v889_v57 }
 0x20d   :  { %v892_v59 = vsel %vm575_vm1, %v845_v56, %v847_v58 }
 0x20e   :  { %988 = vmatprep.subr.bf16.mxu1 %v892_v59  ;;  %v2623_v39 = vpop.permute.xlu1 %1325 }
 0x20f   :  { %989 = vmatpush1.bf16.msra.mxu1 %v891_v31  ;;  %1809 = vmatmul.mubr.msk.bf16.vlgmr.msra.gmra.mxu0 %vm929_vm14, %v251_v30 }
 0x210   :  { %1715 = vmatprep.mubr.bf16.mxu0 %v2013_v2 }
 0x212   :  { %1810 = vmatmul.mubr.msk.bf16.vlgmr.msra.gmra.mxu1 %vm929_vm14, %v251_v30  ;;  %v2628_v60 = vpop.permute.xlu1 %1327 }
 0x213   :  { %1756 = vmatprep.mubr.bf16.mxu1 %v2013_v2 }
 0x216   :  { %v1332_v61 = vpop.permute.xlu1 %1331 }
 0x217   :  { %v1345_v63 = vmul.f32 %v2631_v62, %v1332_v61 }
 0x219   :  { %v2634_v0 = vpop.permute.xlu0 %810  ;;  %1523 = vrot.lane.b32.xlu0 %v1345_v63, %s2023_s1 }
 0x21a   :  { %v2637_v1 = vpop.permute.xlu1 %1249 }
 0x21d   :  { %v1330_v4 = vpop.permute.xlu0 %1329 }
 0x21e   :  { %v2641_v25 = vsel %vm575_vm1, %v2628_v60, %v1330_v4  ;;  %v2644_v5 = vsel %vm575_vm1, %v1330_v4, %v1332_v61  ;;  %v1254_v2 = vpop.permute.xlu1 %1253 }
 0x21f   :  { %v1267_v27 = vmul.f32 %v2631_v62, %v1254_v2 }
 0x221   :  { %v2647_v18 = vpop.permute.xlu0 %1247  ;;  %1475 = vrot.lane.b32.xlu1 %v1267_v27, %s2024_s0 }
 0x222   :  { %v2650_v32 = vpop.permute.xlu1 %1288 }
 0x225   :  { %v1252_v33 = vpop.permute.xlu0 %1251 }
 0x226   :  { %v2654_v20 = vsel %vm493_vm2, %v2637_v1, %v1252_v33  ;;  %v2657_v16 = vsel %vm493_vm2, %v1252_v33, %v1254_v2  ;;  %v1293_v44 = vpop.permute.xlu1 %1292 }
 0x227   :  { %v1306_v26 = vmul.f32 %v2631_v62, %v1293_v44 }
 0x229   :  { %v2660_v19 = vpop.permute.xlu0 %1286  ;;  %1499 = vrot.lane.b32.xlu0 %v1306_v26, %s2025_s30 }
 0x22a   :  { %v2663_v17 = vpop.permute.xlu1 %1210 }
 0x22d   :  { %v1291_v49 = vpop.permute.xlu0 %1290 }
 0x22e   :  { %v2667_v22 = vsel %vm534_vm3, %v2650_v32, %v1291_v49  ;;  %v2670_v46 = vsel %vm534_vm3, %v1291_v49, %v1293_v44  ;;  %v1215_v35 = vpop.permute.xlu1 %1214 }
 0x22f   :  { %v1228_v28 = vmul.f32 %v2631_v62, %v1215_v35 }
 0x231   :  { %v2673_v53 = vpop.permute.xlu0 %1208  ;;  %1451 = vrot.lane.b32.xlu1 %v1228_v28, %s2026_s10 }
 0x232   :  { %v1128_v12 = vpop.permute.xlu1 %1127 }
 0x235   :  { %v1213_v36 = vpop.permute.xlu0 %1212 }
 0x236   :  { %v2678_v3 = vsel %vm452_vm4, %v2663_v17, %v1213_v36  ;;  %v2681_v38 = vsel %vm452_vm4, %v1213_v36, %v1215_v35  ;;  %v2706_v47 = vpop.permute.xlu1 %1131  ;;  %v1333_v35 = vsel %vm575_vm1, %v2623_v39, %v2628_v60 }
 0x239   :  { %v2683_v6 = vpop.permute.xlu0 %1125 }
 0x23a   :  { %v1141_v43 = vmul.f32 %v2631_v62, %v2683_v6  ;;  %v2710_v15 = vpop.permute.xlu1 %1166 }
 0x23c   :  { %1375 = vrot.lane.b32.xlu0 %v1141_v43, %s2027_s11 }
 0x23d   :  { %v2692_v45 = vpop.permute.xlu0 %1129 }
 0x23e   :  { %v2714_v50 = vpop.permute.xlu1 %1170 }
 0x240   :  { %1047 = vrot.lane.b32.xlu0 %v1034_v52, %s2022_s25 }
 0x241   :  { %v2696_v48 = vpop.permute.xlu0 %1164 }
 0x242   :  { %v1180_v34 = vmul.f32 %v2631_v62, %v2696_v48  ;;  %v2718_v51 = vpop.permute.xlu1 %1088 }
 0x244   :  { %1399 = vrot.lane.b32.xlu1 %v1180_v34, %s2021_s22  ;;  %1051 = vrot.lane.b32.xlu0 %v1042_v37, %s2022_s25 }
 0x245   :  { %v2708_v8 = vpop.permute.xlu0 %1168 }
 0x246   :  { %v2722_v11 = vpop.permute.xlu1 %1092 }
 0x248   :  { %1049 = vrot.lane.b32.xlu1 %v1038_v23, %s2022_s25 }
 0x249   :  { %v2712_v42 = vpop.permute.xlu0 %1086 }
 0x24c   :  { %1053 = vrot.lane.b32.xlu1 %v1046_v10, %s2022_s25 }
 0x24d   :  { %v2716_v13 = vpop.permute.xlu0 %1090 }
 0x28b   :  { %v2720_v9 = vpop.permute.xlu0 %1523 }
 0x293   :  { %v2726_v41 = vpop.permute.xlu1 %1475 }
 0x29b   :  { %v2724_v29 = vpop.permute.xlu0 %1499 }
 0x2a3   :  { %v2730_v55 = vpop.permute.xlu1 %1451 }
 0x2ae   :  { %v2728_v54 = vpop.permute.xlu0 %1375 }
 0x2b2   :  { %v2732_v14 = vpop.permute.xlu0 %1047 }
 0x2b6   :  { %v2734_v56 = vpop.permute.xlu1 %1399  ;;  %v2736_v21 = vpop.permute.xlu0 %1051 }
 0x2ba   :  { %v2738_v24 = vpop.permute.xlu1 %1049 }
 0x2bb   :  { %v2743_v40 = vsel %vm283_vm13, %v2738_v24, %v2736_v21 }
 0x2cf   :  { %v967_v57 = vpop.f32.mrf.mxu0 }
 0x2d0   :  { %v968_v58 = vadd.f32 %v967_v57, %v2634_v0 }
 0x2d1   :  { %v969_v59 = vpop.f32.mrf.mxu0 }
 0x2d2   :  { %v1008_v30 = vpop.f32.mrf.mxu1  ;;  %v2746_v31 = vmax.f32 %v968_v58, 0.0  ;;  %v970_v61 = vadd.f32 %v969_v59, %v2634_v0 }
 0x2d3   :  { %v1009_v63 = vadd.f32 %v1008_v30, %v2634_v0  ;;  %v971_v4 = vpop.f32.mrf.mxu0 }
 0x2d4   :  { %v1010_v2 = vpop.f32.mrf.mxu1  ;;  %1019 = vst [vmem:[#allocation2 + $0x28] sm:$0xff] %v2746_v31  ;;  %v2751_v27 = vmax.f32 %v970_v61, 0.0 }
 0x2d5   :  { %v2753_v33 = vmax.f32 %v1009_v63, 0.0  ;;  %v1011_v44 = vadd.f32 %v1010_v2, %v2634_v0  ;;  %v972_v26 = vpop.f32.mrf.mxu0  ;;  %v1302_v2 = vmul.f32 %v2660_v19, %v2746_v31 }
 0x2d6   :  { %v1012_v49 = vpop.f32.mrf.mxu1  ;;  %1020 = vst [vmem:[#allocation2] sm:$0xff] %v2751_v27  ;;  %v1918_v36 = vpack.i.bf16 %v2751_v27, %v2746_v31  ;;  %v1342_v0 = vmul.f32 %v1333_v35, %v2751_v27 }
 0x2d7   :  { %1021 = vst [vmem:[#allocation2 + $0x10] sm:$0xff] %v2753_v33  ;;  %v2761_v28 = vmax.f32 %v1011_v44, 0.0  ;;  %v1343_v43 = vmul.f32 %v2641_v25, %v2753_v33  ;;  %v1265_v37 = vmul.f32 %v2654_v20, %v2753_v33  ;;  %v1255_v25 = vsel %vm493_vm2, %v2647_v18, %v2637_v1 }
 0x2d8   :  { %v1013_v7 = vpop.f32.mrf.mxu1  ;;  %1919 = vrot.lane.b32.xlu1 %v1918_v36, %s2022_s25  ;;  %v1304_v23 = vmul.f32 %v2667_v22, %v2753_v33  ;;  %v1264_v20 = vmul.f32 %v1255_v25, %v2751_v27  ;;  %v1226_v59 = vmul.f32 %v2678_v3, %v2753_v33  ;;  %v1133_v22 = vsel %vm365_vm5, %v2683_v6, %v1128_v12 }
 0x2d9   :  { %1022 = vst [vmem:[#allocation2 + $0x18] sm:$0xff] %v2761_v28  ;;  %v1923_v60 = vpack.i.bf16 %v2761_v28, %v2753_v33  ;;  %v1344_v52 = vmul.f32 %v2644_v5, %v2761_v28  ;;  %v1266_v34 = vmul.f32 %v2657_v16, %v2761_v28  ;;  %v1305_v10 = vmul.f32 %v2670_v46, %v2761_v28 }
 0x2da   :  { %v1341_v5 = vmul.f32 %v2623_v39, %v2746_v31  ;;  %v1227_v1 = vmul.f32 %v2681_v38, %v2761_v28  ;;  %v1134_v46 = vsel %vm365_vm5, %v1128_v12, %v2692_v45  ;;  %v1263_v39 = vmul.f32 %v2647_v18, %v2746_v31 }
 0x2db   :  { %1924 = vrot.lane.b32.xlu0 %v1923_v60, %s2022_s25  ;;  %v1933_v57 = vpack.i.bf16 %v1344_v52, %v1343_v43  ;;  %v1943_v58 = vpack.i.bf16 %v1266_v34, %v1265_v37  ;;  %v1953_v16 = vpack.i.bf16 %v1305_v10, %v1304_v23  ;;  %v1142_v63 = vmul.f32 %v1133_v22, %v2746_v31 }
 0x2dc   :  { %v1928_v30 = vpack.i.bf16 %v1342_v0, %v1341_v5  ;;  %v1963_v61 = vpack.i.bf16 %v1227_v1, %v1226_v59  ;;  %v1143_v3 = vmul.f32 %v1134_v46, %v2751_v27  ;;  %v1938_v38 = vpack.i.bf16 %v1264_v20, %v1263_v39 }
 0x2dd   :  { %1934 = vrot.lane.b32.xlu1 %v1933_v57, %s2023_s1  ;;  %v1294_v6 = vsel %vm534_vm3, %v2660_v19, %v2650_v32  ;;  %v1216_v18 = vsel %vm452_vm4, %v2673_v53, %v2663_v17  ;;  %v1224_v32 = vmul.f32 %v2673_v53, %v2746_v31  ;;  %v1145_v35 = vmul.f32 %v2706_v47, %v2761_v28 }
 0x2de   :  { %v1968_v4 = vpack.i.bf16 %v1143_v3, %v1142_v63  ;;  %v1303_v12 = vmul.f32 %v1294_v6, %v2751_v27  ;;  %v1225_v44 = vmul.f32 %v1216_v18, %v2751_v27  ;;  %v1135_v17 = vsel %vm365_vm5, %v2692_v45, %v2706_v47 }
 0x2df   :  { %1929 = vrot.lane.b32.xlu0 %v1928_v30, %s2023_s1  ;;  %v1144_v19 = vmul.f32 %v1135_v17, %v2753_v33  ;;  %v1173_v36 = vsel %vm406_vm6, %v2710_v15, %v2708_v8  ;;  %v1174_v53 = vsel %vm406_vm6, %v2708_v8, %v2714_v50  ;;  %v1184_v43 = vmul.f32 %v2714_v50, %v2761_v28 }
 0x2e0   :  { %v1948_v26 = vpack.i.bf16 %v1303_v12, %v1302_v2  ;;  %v1958_v49 = vpack.i.bf16 %v1225_v44, %v1224_v32  ;;  %v1183_v45 = vmul.f32 %v1174_v53, %v2753_v33  ;;  %v1182_v47 = vmul.f32 %v1173_v36, %v2751_v27 }
 0x2e1   :  { %1939 = vrot.lane.b32.xlu1 %v1938_v38, %s2024_s0  ;;  %v1973_v7 = vpack.i.bf16 %v1145_v35, %v1144_v19  ;;  %v1172_v0 = vsel %vm406_vm6, %v2696_v48, %v2710_v15  ;;  %v1095_v8 = vsel %vm324_vm7, %v2718_v51, %v2716_v13  ;;  %v1096_v60 = vsel %vm324_vm7, %v2716_v13, %v2722_v11 }
 0x2e2   :  { %v1983_v50 = vpack.i.bf16 %v1184_v43, %v1183_v45  ;;  %v1181_v52 = vmul.f32 %v1172_v0, %v2746_v31  ;;  %v1106_v37 = vmul.f32 %v2722_v11, %v2761_v28  ;;  %v1094_v48 = vsel %vm324_vm7, %v2712_v42, %v2718_v51  ;;  %v2864_v51 = vpop.permute.xlu1 %1053 }
 0x2e3   :  { %1944 = vrot.lane.b32.xlu0 %v1943_v58, %s2024_s0  ;;  %v1105_v34 = vmul.f32 %v1096_v60, %v2753_v33  ;;  %v1104_v25 = vmul.f32 %v1095_v8, %v2751_v27  ;;  %v1103_v23 = vmul.f32 %v1094_v48, %v2746_v31  ;;  %v1102_v11 = vmul.f32 %v2631_v62, %v2712_v42 }
 0x2e4   :  { %v1978_v15 = vpack.i.bf16 %v1182_v47, %v1181_v52 }
 0x2e5   :  { %1954 = vrot.lane.b32.xlu1 %v1953_v16, %s2025_s30  ;;  %v1993_v13 = vpack.i.bf16 %v1106_v37, %v1105_v34  ;;  %v1988_v10 = vpack.i.bf16 %v1104_v25, %v1103_v23 }
 0x2e7   :  { %1949 = vrot.lane.b32.xlu0 %v1948_v26, %s2025_s30 }
 0x2e9   :  { %1959 = vrot.lane.b32.xlu1 %v1958_v49, %s2026_s10 }
 0x2eb   :  { %1964 = vrot.lane.b32.xlu0 %v1963_v61, %s2026_s10 }
 0x2ed   :  { %1974 = vrot.lane.b32.xlu1 %v1973_v7, %s2027_s11 }
 0x2ef   :  { %1969 = vrot.lane.b32.xlu0 %v1968_v4, %s2027_s11 }
 0x2f1   :  { %1984 = vrot.lane.b32.xlu1 %v1983_v50, %s2021_s22 }
 0x2f3   :  { %1979 = vrot.lane.b32.xlu0 %v1978_v15, %s2021_s22 }
 0x2f5   :  { %1994 = vrot.lane.b32.xlu1 %v1993_v13, %s2020_s18 }
 0x2f7   :  { %1989 = vrot.lane.b32.xlu0 %v1988_v10, %s2020_s18 }
 0x2fb   :  { %1351 = vrot.lane.b32.xlu0 %v1102_v11, %s2020_s18 }
 0x34a   :  { %v2866_v57 = vpop.permute.xlu1 %1919 }
 0x34b   :  { %v1921_v3 = vunpack.i.l.bf16 %v2866_v57 }
 0x34d   :  { %v2868_v5 = vpop.permute.xlu0 %1924 }
 0x34f   :  { %v1935_v20 = vpop.permute.xlu1 %1934 }
 0x350   :  { %v1937_v19 = vunpack.i.h.bf16 %v1935_v20  ;;  %v1936_v53 = vunpack.i.l.bf16 %v1935_v20 }
 0x351   :  { %v1930_v58 = vpop.permute.xlu0 %1929 }
 0x352   :  { %v1931_v16 = vunpack.i.l.bf16 %v1930_v58  ;;  %v1932_v44 = vunpack.i.h.bf16 %v1930_v58  ;;  %v1527_v60 = vsel %vm772_vm9, %v1936_v53, %v1937_v19 }
 0x353   :  { %v1940_v59 = vpop.permute.xlu1 %1939  ;;  %v1557_v48 = vpack.c.bf16 %v2631_v62, %v1527_v60 }
 0x354   :  { %v1554_v1 = vpack.c.bf16 %v2631_v62, %v1931_v16  ;;  %v1941_v30 = vunpack.i.l.bf16 %v1940_v59  ;;  %v1525_v7 = vsel %vm772_vm9, %v1931_v16, %v1932_v44  ;;  %v1526_v0 = vsel %vm772_vm9, %v1932_v44, %v1936_v53 }
 0x355   :  { %v2871_v22 = vpop.permute.xlu0 %1944  ;;  %v1555_v8 = vpack.c.bf16 %v2631_v62, %v1525_v7  ;;  %v1556_v52 = vpack.c.bf16 %v2631_v62, %v1526_v0  ;;  %v1942_v15 = vunpack.i.h.bf16 %v1940_v59  ;;  %v1927_v44 = vunpack.i.h.bf16 %v2868_v5 }
 0x356   :  { %1630 = vrot.lane.b32.xlu1 %v1554_v1, %s2015_s21  ;;  %v1947_v23 = vunpack.i.h.bf16 %v2871_v22  ;;  %v1922_v1 = vunpack.i.h.bf16 %v2866_v57 }
 0x357   :  { %v1955_v42 = vpop.permute.xlu1 %1954  ;;  %v1477_v20 = vsel %vm722_vm11, %v1941_v30, %v1942_v15 }
 0x358   :  { %v1956_v37 = vunpack.i.l.bf16 %v1955_v42  ;;  %v1957_v34 = vunpack.i.h.bf16 %v1955_v42 }
 0x359   :  { %v1950_v46 = vpop.permute.xlu0 %1949 }
 0x35a   :  { %v1951_v39 = vunpack.i.l.bf16 %v1950_v46  ;;  %v1952_v50 = vunpack.i.h.bf16 %v1950_v46  ;;  %v1504_v58 = vsel %vm747_vm10, %v1957_v34, %v2724_v29  ;;  %v1503_v42 = vsel %vm747_vm10, %v1956_v37, %v1957_v34 }
 0x35b   :  { %v2874_v61 = vpop.permute.xlu1 %1959 }
 0x35c   :  { %v1549_v63 = vpack.c.bf16 %v1951_v39, %v1941_v30  ;;  %v1961_v38 = vunpack.i.l.bf16 %v2874_v61  ;;  %v1502_v25 = vsel %vm747_vm10, %v1952_v50, %v1956_v37  ;;  %v1962_v16 = vunpack.i.h.bf16 %v2874_v61 }
 0x35d   :  { %v2878_v6 = vpop.permute.xlu0 %1964  ;;  %v1926_v30 = vunpack.i.l.bf16 %v2868_v5 }
 0x35e   :  { %1620 = vrot.lane.b32.xlu0 %v1549_v63, %s2015_s21  ;;  %v1544_v4 = vpack.c.bf16 %v1961_v38, %v1921_v3  ;;  %v1966_v46 = vunpack.i.l.bf16 %v2878_v6  ;;  %v1453_v61 = vsel %vm697_vm12, %v1961_v38, %v1962_v16  ;;  %v1967_v63 = vunpack.i.h.bf16 %v2878_v6 }
 0x35f   :  { %v2883_v12 = vpop.permute.xlu1 %1974  ;;  %v1431_v53 = vsel %vm283_vm13, %v1922_v1, %v1926_v30  ;;  %v1432_v57 = vsel %vm283_vm13, %v1926_v30, %v1927_v44 }
 0x360   :  { %1610 = vrot.lane.b32.xlu1 %v1544_v4, %s2015_s21  ;;  %v1977_v32 = vunpack.i.h.bf16 %v2883_v12  ;;  %v1455_v38 = vsel %vm697_vm12, %v1966_v46, %v1967_v63  ;;  %v1456_v5 = vsel %vm697_vm12, %v1967_v63, %v2730_v55  ;;  %v1976_v0 = vunpack.i.l.bf16 %v2883_v12 }
 0x361   :  { %v2886_v18 = vpop.permute.xlu0 %1969  ;;  %v1055_v55 = vsel %vm283_vm13, %v2732_v14, %v2738_v24 }
 0x362   :  { %v1971_v26 = vunpack.i.l.bf16 %v2886_v18 }
 0x363   :  { %v2888_v2 = vpop.permute.xlu1 %1984 }
 0x364   :  { %v1987_v49 = vunpack.i.h.bf16 %v2888_v2  ;;  %v1385_v43 = vsel %vm628_vm8, %v2728_v54, %v1971_v26  ;;  %v1528_v54 = vsel %vm772_vm9, %v1937_v19, %v2720_v9  ;;  %v1501_v9 = vsel %vm747_vm10, %v1951_v39, %v1952_v50 }
 0x365   :  { %v2893_v35 = vpop.permute.xlu0 %1979  ;;  %v1558_v13 = vpack.c.bf16 %v2631_v62, %v1528_v54  ;;  %v1550_v59 = vpack.c.bf16 %v1501_v9, %v1477_v20  ;;  %v1454_v19 = vsel %vm697_vm12, %v1962_v16, %v1966_v46  ;;  %v1067_v16 = vmul.f32 %v2864_v51, %v2761_v28 }
 0x366   :  { %v1981_v17 = vunpack.i.l.bf16 %v2893_v35  ;;  %v1543_v36 = vpack.c.bf16 %v1987_v49, %v1977_v32  ;;  %v1982_v6 = vunpack.i.h.bf16 %v2893_v35  ;;  %v1546_v7 = vpack.c.bf16 %v1454_v19, %v1431_v53 }
 0x367   :  { %v1995_v54 = vpop.permute.xlu1 %1994  ;;  %v1057_v35 = vsel %vm283_vm13, %v2736_v21, %v2864_v51 }
 0x368   :  { %v1409_v45 = vsel %vm324_vm7, %v2734_v56, %v1981_v17  ;;  %1608 = vrot.lane.b32.xlu1 %v1543_v36, %s2015_s21  ;;  %v1946_v56 = vunpack.i.l.bf16 %v2871_v22  ;;  %v1480_v22 = vsel %vm722_vm11, %v1947_v23, %v2726_v41  ;;  %v1430_v41 = vsel %vm283_vm13, %v1921_v3, %v1922_v1 }
 0x369   :  { %v1539_v47 = vpack.c.bf16 %v1409_v45, %v1385_v43  ;;  %v1553_v39 = vpack.c.bf16 %v1504_v58, %v1480_v22  ;;  %v1545_v36 = vpack.c.bf16 %v1453_v61, %v1430_v41  ;;  %v1990_v43 = vpop.permute.xlu0 %1989  ;;  %v1972_v3 = vunpack.i.h.bf16 %v2886_v18 }
 0x36a   :  { %v1478_v10 = vsel %vm722_vm11, %v1942_v15, %v1946_v56  ;;  %v1479_v29 = vsel %vm722_vm11, %v1946_v56, %v1947_v23  ;;  %v1986_v45 = vunpack.i.l.bf16 %v2888_v2  ;;  %v1992_v60 = vunpack.i.h.bf16 %v1990_v43 }
 0x36b   :  { %1600 = vrot.lane.b32.xlu0 %v1539_v47, %s2015_s21  ;;  %v1551_v11 = vpack.c.bf16 %v1502_v25, %v1478_v10  ;;  %v1552_v4 = vpack.c.bf16 %v1503_v42, %v1479_v29  ;;  %v1547_v47 = vpack.c.bf16 %v1455_v38, %v1432_v57  ;;  %v1991_v50 = vunpack.i.l.bf16 %v1990_v43 }
 0x36c   :  { %1632 = vrot.lane.b32.xlu1 %v1555_v8, %s2015_s21  ;;  %v1411_v8 = vsel %vm324_vm7, %v1982_v6, %v1986_v45  ;;  %v1387_v56 = vsel %vm628_vm8, %v1972_v3, %v1976_v0  ;;  %v1410_v37 = vsel %vm324_vm7, %v1981_v17, %v1982_v6  ;;  %v1386_v15 = vsel %vm628_vm8, %v1971_v26, %v1972_v3 }
 0x36d   :  { %v1997_v34 = vunpack.i.h.bf16 %v1995_v54  ;;  %v1996_v25 = vunpack.i.l.bf16 %v1995_v54  ;;  %v1064_v23 = vmul.f32 %v1055_v55, %v2746_v31  ;;  %v1540_v24 = vpack.c.bf16 %v1410_v37, %v1386_v15  ;;  %v1352_v20 = vpop.permute.xlu0 %1351 }
 0x36e   :  { %v1412_v17 = vsel %vm324_vm7, %v1986_v45, %v1987_v49  ;;  %v1388_v26 = vsel %vm628_vm8, %v1976_v0, %v1977_v32  ;;  %v1066_v9 = vmul.f32 %v1057_v35, %v2753_v33  ;;  %v1065_v2 = vmul.f32 %v2743_v40, %v2751_v27  ;;  %v1559_v40 = vld [vmem:[%s3053_s7] sm:$0xff] }
 0x36f   :  { %1634 = vrot.lane.b32.xlu0 %v1556_v52, %s2015_s21  ;;  %v1548_v52 = vpack.c.bf16 %v1456_v5, %v1927_v44  ;;  %v1364_v10 = vsel %vm406_vm6, %v1996_v25, %v1997_v34  ;;  %v1363_v21 = vsel %vm406_vm6, %v1992_v60, %v1996_v25  ;;  %v1361_v12 = vsel %vm406_vm6, %v1352_v20, %v1991_v50 }
 0x370   :  { %1636 = vrot.lane.b32.xlu1 %v1557_v48, %s2015_s21  ;;  %v1541_v48 = vpack.c.bf16 %v1411_v8, %v1387_v56  ;;  %v1537_v49 = vpack.c.bf16 %v1364_v10, %v1066_v9  ;;  %v1063_v32 = vmul.f32 %v2631_v62, %v2732_v14  ;;  %v1536_v58 = vpack.c.bf16 %v1363_v21, %v1065_v2 }
 0x371   :  { %v1538_v1 = vpack.c.bf16 %v1997_v34, %v1067_v16 }
 0x373   :  { %1638 = vrot.lane.b32.xlu0 %v1558_v13, %s2015_s21  ;;  %v1362_v13 = vsel %vm406_vm6, %v1991_v50, %v1992_v60 }
 0x374   :  { %1624 = vrot.lane.b32.xlu1 %v1551_v11, %s2015_s21  ;;  %v1535_v18 = vpack.c.bf16 %v1362_v13, %v1064_v23  ;;  %v1542_v11 = vpack.c.bf16 %v1412_v17, %v1388_v26  ;;  %v1023_v17 = vld [vmem:[%s3054_s6] sm:$0xf] }
 0x377   :  { %1622 = vrot.lane.b32.xlu0 %v1550_v59, %s2015_s21  ;;  %v1534_v59 = vpack.c.bf16 %v1361_v12, %v1063_v32 }
 0x378   :  { %1628 = vrot.lane.b32.xlu1 %v1553_v39, %s2015_s21 }
 0x37b   :  { %1626 = vrot.lane.b32.xlu0 %v1552_v4, %s2015_s21 }
 0x37c   :  { %1612 = vrot.lane.b32.xlu1 %v1545_v36, %s2015_s21 }
 0x37f   :  { %1614 = vrot.lane.b32.xlu0 %v1546_v7, %s2015_s21 }
 0x380   :  { %1616 = vrot.lane.b32.xlu1 %v1547_v47, %s2015_s21 }
 0x383   :  { %1618 = vrot.lane.b32.xlu0 %v1548_v52, %s2015_s21 }
 0x384   :  { %1604 = vrot.lane.b32.xlu1 %v1541_v48, %s2015_s21 }
 0x387   :  { %1602 = vrot.lane.b32.xlu0 %v1540_v24, %s2015_s21 }
 0x388   :  { %1592 = vrot.lane.b32.xlu1 %v1535_v18, %s2015_s21 }
 0x38b   :  { %1606 = vrot.lane.b32.xlu0 %v1542_v11, %s2015_s21 }
 0x38c   :  { %1596 = vrot.lane.b32.xlu1 %v1537_v49, %s2015_s21 }
 0x38f   :  { %1594 = vrot.lane.b32.xlu0 %v1536_v58, %s2015_s21 }
 0x390   :  { %1590 = vrot.lane.b32.xlu1 %v1534_v59, %s2015_s21 }
 0x393   :  { %1598 = vrot.lane.b32.xlu0 %v1538_v1, %s2015_s21 }
 0x397   :  { %1562 = vperm.xlu0 %1917, %v1559_v40  }
 0x3c8   :  { %v1631_v62 = vpop.permute.xlu1 %1630 }
 0x3d0   :  { %v1621_v22 = vpop.permute.xlu0 %1620 }
 0x3d2   :  { %v1611_v14 = vpop.permute.xlu1 %1610 }
 0x3da   :  { %v1609_v42 = vpop.permute.xlu1 %1608 }
 0x3dd   :  { %v1601_v46 = vpop.permute.xlu0 %1600 }
 0x3de   :  { %v1633_v39 = vpop.permute.xlu1 %1632 }
 0x3df   :  { %v1656_v29 = vsel %vm575_vm1, %v1631_v62, %v1633_v39 }
 0x3e1   :  { %v1635_v51 = vpop.permute.xlu0 %1634 }
 0x3e2   :  { %v1657_v30 = vsel %vm575_vm1, %v1633_v39, %v1635_v51  ;;  %v1637_v61 = vpop.permute.xlu1 %1636 }
 0x3e3   :  { %1689 = vmatprep.subr.bf16.mxu0 %v1657_v30  ;;  %v1658_v41 = vsel %vm575_vm1, %v1635_v51, %v1637_v61 }
 0x3e4   :  { %1690 = vmatpush1.bf16.msra.mxu0 %v1656_v29 }
 0x3e5   :  { %v1639_v63 = vpop.permute.xlu0 %1638 }
 0x3e6   :  { %v1659_v4 = vsel %vm575_vm1, %v1637_v61, %v1639_v63  ;;  %v1625_v44 = vpop.permute.xlu1 %1624 }
 0x3e7   :  { %1730 = vmatprep.subr.bf16.mxu1 %v1659_v4 }
 0x3e8   :  { %1731 = vmatpush1.bf16.msra.mxu1 %v1658_v41 }
 0x3e9   :  { %v1623_v19 = vpop.permute.xlu0 %1622 }
 0x3ea   :  { %v1652_v36 = vsel %vm575_vm1, %v1621_v22, %v1623_v19  ;;  %v1653_v53 = vsel %vm575_vm1, %v1623_v19, %v1625_v44  ;;  %v1629_v38 = vpop.permute.xlu1 %1628 }
 0x3eb   :  { %1691 = vmatprep.subr.bf16.mxu0 %v1653_v53 }
 0x3ec   :  { %1692 = vmatpush1.bf16.msra.mxu0 %v1652_v36 }
 0x3ed   :  { %v1627_v6 = vpop.permute.xlu0 %1626 }
 0x3ee   :  { %v1654_v7 = vsel %vm575_vm1, %v1625_v44, %v1627_v6  ;;  %v1655_v43 = vsel %vm575_vm1, %v1627_v6, %v1629_v38  ;;  %v1613_v57 = vpop.permute.xlu1 %1612 }
 0x3ef   :  { %1732 = vmatprep.subr.bf16.mxu1 %v1655_v43  ;;  %v1648_v45 = vsel %vm575_vm1, %v1611_v14, %v1613_v57 }
 0x3f0   :  { %1733 = vmatpush1.bf16.msra.mxu1 %v1654_v7 }
 0x3f1   :  { %v1615_v5 = vpop.permute.xlu0 %1614 }
 0x3f2   :  { %v1649_v3 = vsel %vm575_vm1, %v1613_v57, %v1615_v5  ;;  %v1617_v47 = vpop.permute.xlu1 %1616 }
 0x3f3   :  { %1693 = vmatprep.subr.bf16.mxu0 %v1649_v3  ;;  %v1650_v60 = vsel %vm575_vm1, %v1615_v5, %v1617_v47 }
 0x3f4   :  { %1694 = vmatpush1.bf16.msra.mxu0 %v1648_v45 }
 0x3f5   :  { %v1619_v0 = vpop.permute.xlu0 %1618 }
 0x3f6   :  { %v1651_v8 = vsel %vm575_vm1, %v1617_v47, %v1619_v0  ;;  %v1605_v50 = vpop.permute.xlu1 %1604 }
 0x3f7   :  { %1734 = vmatprep.subr.bf16.mxu1 %v1651_v8 }
 0x3f8   :  { %1735 = vmatpush1.bf16.msra.mxu1 %v1650_v60 }
 0x3f9   :  { %v1603_v52 = vpop.permute.xlu0 %1602 }
 0x3fa   :  { %v1644_v54 = vsel %vm575_vm1, %v1601_v46, %v1603_v52  ;;  %v1645_v55 = vsel %vm575_vm1, %v1603_v52, %v1605_v50  ;;  %v1593_v56 = vpop.permute.xlu1 %1592 }
 0x3fb   :  { %1695 = vmatprep.subr.bf16.mxu0 %v1645_v55 }
 0x3fc   :  { %1696 = vmatpush1.bf16.msra.mxu0 %v1644_v54 }
 0x3fd   :  { %v1607_v37 = vpop.permute.xlu0 %1606 }
 0x3fe   :  { %v1646_v48 = vsel %vm575_vm1, %v1605_v50, %v1607_v37  ;;  %v1647_v15 = vsel %vm575_vm1, %v1607_v37, %v1609_v42  ;;  %v1597_v34 = vpop.permute.xlu1 %1596 }
 0x3ff   :  { %1736 = vmatprep.subr.bf16.mxu1 %v1647_v15 }
 0x400   :  { %1737 = vmatpush1.bf16.msra.mxu1 %v1646_v48 }
 0x401   :  { %v1595_v25 = vpop.permute.xlu0 %1594 }
 0x402   :  { %v1641_v13 = vsel %vm575_vm1, %v1593_v56, %v1595_v25  ;;  %v1591_v23 = vpop.permute.xlu1 %1590  ;;  %v1642_v26 = vsel %vm575_vm1, %v1595_v25, %v1597_v34 }
 0x403   :  { %1697 = vmatprep.subr.bf16.mxu0 %v1641_v13  ;;  %v1640_v24 = vsel %vm575_vm1, %v1591_v23, %v1593_v56 }
 0x404   :  { %1698 = vmatpush1.bf16.msra.mxu0 %v1640_v24 }
 0x405   :  { %v1599_v35 = vpop.permute.xlu0 %1598 }
 0x406   :  { %v1643_v18 = vsel %vm575_vm1, %v1597_v34, %v1599_v35 }
 0x407   :  { %1738 = vmatprep.subr.bf16.mxu1 %v1643_v18  ;;  %1818 = vmatmul.mubr.msk.bf16.vlgmr.msra.gmra.mxu0 %vm929_vm14, %v1023_v17 }
 0x408   :  { %1739 = vmatpush1.bf16.msra.mxu1 %v1642_v26 }
 0x40b   :  { %1819 = vmatmul.mubr.msk.bf16.vlgmr.msra.gmra.mxu1 %vm929_vm14, %v1023_v17 }
 0x412   :  { %v1563_v10 = vpop.permute.xlu0 %1562 }
 0x4c7   :  { %v1717_v9 = vpop.f32.mrf.mxu0 }
 0x4c8   :  { %v1718_v11 = vadd.f32 %v1717_v9, %v1563_v10 }
 0x4c9   :  { %v1719_v20 = vpop.f32.mrf.mxu0 }
 0x4ca   :  { %v1765_v21 = vadd.f32 %v1718_v11, %v2746_v31  ;;  %v1720_v2 = vadd.f32 %v1719_v20, %v1563_v10 }
 0x4cb   :  { %v1758_v49 = vpop.f32.mrf.mxu1  ;;  %v1721_v12 = vpop.f32.mrf.mxu0 }
 0x4cc   :  { %v1759_v32 = vadd.f32 %v1758_v49, %v1563_v10  ;;  %v1769_v58 = vmax.f32 %v1765_v21, 0.0  ;;  %v1766_v16 = vadd.f32 %v1720_v2, %v2751_v27 }
 0x4cd   :  { %v1760_v59 = vpop.f32.mrf.mxu1  ;;  %v1722_v40 = vpop.f32.mrf.mxu0 }
 0x4ce   :  { %v1767_v1 = vadd.f32 %v1759_v32, %v2753_v33  ;;  %v1761_v62 = vadd.f32 %v1760_v59, %v1563_v10  ;;  %1773 = vst [vmem:[%s3055_s8] sm:$0xff] %v1769_v58  ;;  %v1770_v14 = vmax.f32 %v1766_v16, 0.0 }
 0x4cf   :  { %v1762_v22 = vpop.f32.mrf.mxu1 }
 0x4d0   :  { %v1771_v42 = vmax.f32 %v1767_v1, 0.0  ;;  %v1768_v31 = vadd.f32 %v1761_v62, %v2761_v28  ;;  %1774 = vst [vmem:[%s3055_s8 + $0x8] sm:$0xff] %v1770_v14 }
 0x4d1   :  { %v1763_v46 = vpop.f32.mrf.mxu1 }
 0x4d2   :  { %1820 = vst [vmem:[%s3055_s8 + $0x10] sm:$0xff] %v1771_v42  ;;  %v1772_v27 = vmax.f32 %v1768_v31, 0.0 }
 0x4d4   :  { %1821 = vst [vmem:[%s3055_s8 + $0x18] sm:$0xff] %v1772_v27 }

</bundles_post_ra>
